<compile_context>
chip_gen: v7x
topology: tpu7x:2x2x1
jax: 0.10.0
libtpu: 0.0.40
codegen_flags: <defaults>
</compile_context>

<pallas_src>
import functools

import jax
import jax.numpy as jnp
from jax.experimental import pallas as pl
from jax.experimental.pallas import tpu as pltpu

NEG_SLOPE = 0.01      # PyTorch nn.LeakyReLU default (plain Python float)
LANE = 128
SUBLANE = 8
OUT_LANES = 128       # merged output slab width
OUT_HALF = 64         # logits occupy lanes [0, OUT_HALF), dist [OUT_HALF, 128)


def _round_up(x, m):
    return ((x + m - 1) // m) * m


def _leaky_relu(x):
    return jnp.where(x >= 0, x, NEG_SLOPE * x)


def _rsm_kernel(x_ref, w1_ref, b1_ref, w2_ref, b2_ref, out_ref, *,
                d_out_valid, half):
    """One batch tile: two bf16 MXU matmuls + LeakyReLU + masked softmax.

    Output is a merged (tile_b, 128) slab:
      lanes [0, half)            -> logits (valid in [0, d_out_valid))
      lanes [half, 128)          -> softmax distribution (valid in
                                    [half, half + d_out_valid))
    """
    # Layer 1: bf16 operands, f32 accumulation; bias/activation in f32.
    x = x_ref[...].astype(jnp.bfloat16)                      # (tile_b, d_in)
    h = jnp.dot(x, w1_ref[...], preferred_element_type=jnp.float32) + b1_ref[...]
    h = _leaky_relu(h)                                       # (tile_b, hidden_p) f32

    # Layer 2: W2^T is packed twice (both halves of the 128 output lanes), so a
    # single 128-lane matmul yields the logits in both halves of the slab.
    y = jnp.dot(h.astype(jnp.bfloat16), w2_ref[...],
                preferred_element_type=jnp.float32) + b2_ref[...]
    logits = _leaky_relu(y)                                  # (tile_b, 128) f32

    # Softmax over dim=1, restricted to the valid lanes of the right-half copy.
    lane = jax.lax.broadcasted_iota(jnp.int32, logits.shape, 1)
    in_right = (lane >= half) & (lane < half + d_out_valid)
    masked = jnp.where(in_right, logits, -1e30)              # Python literal, no capture
    m = jnp.max(masked, axis=1, keepdims=True)
    e = jnp.exp(masked - m)                                  # 0 outside valid lanes
    denom = jnp.sum(e, axis=1, keepdims=True)
    dist = e / denom                                         # exact normalization

    # Single lane-dense store: logits on the left, distribution on the right.
    out_ref[...] = jnp.where(lane < half, logits, dist).astype(out_ref.dtype)


def prepare_params(w1, b1, w2, b2):
    """One-time model-state prep: transpose, zero-pad, pack, and cast weights.

    w1: (hidden, d_in), b1: (hidden,), w2: (d_out, hidden), b2: (d_out,)
    Weights are stored in bf16 (MXU operands), biases in f32.
    """
    hidden, d_in = w1.shape
    d_out = w2.shape[0]
    assert d_out <= OUT_HALF, "d_out must fit in half of the 128-lane output slab"
    hidden_p = _round_up(hidden, LANE)

    w1p = jnp.zeros((d_in, hidden_p), jnp.float32).at[:, :hidden].set(w1.T)
    b1p = jnp.zeros((1, hidden_p), jnp.float32).at[:, :hidden].set(b1)

    # Pack W2^T / b2 twice: logits copy in lanes [0, d_out), softmax copy in
    # lanes [OUT_HALF, OUT_HALF + d_out).  Remaining lanes stay zero.
    w2t = w2.T.astype(jnp.float32)
    w2p = jnp.zeros((hidden_p, OUT_LANES), jnp.float32)
    w2p = w2p.at[:hidden, :d_out].set(w2t)
    w2p = w2p.at[:hidden, OUT_HALF:OUT_HALF + d_out].set(w2t)
    b2p = jnp.zeros((1, OUT_LANES), jnp.float32)
    b2p = b2p.at[:, :d_out].set(b2)
    b2p = b2p.at[:, OUT_HALF:OUT_HALF + d_out].set(b2)

    return dict(
        w1=w1p.astype(jnp.bfloat16), b1=b1p,
        w2=w2p.astype(jnp.bfloat16), b2=b2p,
        d_in=d_in, hidden=hidden, d_out=d_out, hidden_p=hidden_p,
    )


def rsm_predictor_forward(x, params, *, tile_b=1024):
    """x: (B, d_in) f32 or bf16.  Returns (distribution, logits), each (B, d_out)."""
    B, d_in = x.shape
    assert d_in == params["d_in"]
    d_out = params["d_out"]
    hidden_p = params["hidden_p"]

    # Batch tile: multiple of 8 sublanes.  Clamp so that small batches still
    # produce >= 2 grid steps (keeps both v7x TensorCores busy on the
    # "parallel" batch axis); large batches keep the big tile to amortize the
    # ~0.35 us per-step pipeline overhead.
    half_batch = _round_up(max(1, -(-B // 2)), SUBLANE)
    tile_b = max(SUBLANE, min(tile_b, half_batch))
    b_pad = _round_up(B, tile_b)
    if b_pad != B:
        x = jnp.pad(x, ((0, b_pad - B), (0, 0)))

    grid = (b_pad // tile_b,)
    kernel = functools.partial(_rsm_kernel, d_out_valid=d_out, half=OUT_HALF)

    out = pl.pallas_call(
        kernel,
        out_shape=jax.ShapeDtypeStruct((b_pad, OUT_LANES), jnp.float32),
        grid_spec=pltpu.PrefetchScalarGridSpec(
            num_scalar_prefetch=0,
            grid=grid,
            in_specs=[
                # streamed activation tile (last dim == full d_in, legal block)
                pl.BlockSpec((tile_b, d_in), lambda i: (i, 0)),
                # weights / biases: whole-array blocks, resident across the grid
                pl.BlockSpec((d_in, hidden_p), lambda i: (0, 0)),
                pl.BlockSpec((1, hidden_p), lambda i: (0, 0)),
                pl.BlockSpec((hidden_p, OUT_LANES), lambda i: (0, 0)),
                pl.BlockSpec((1, OUT_LANES), lambda i: (0, 0)),
            ],
            out_specs=pl.BlockSpec((tile_b, OUT_LANES), lambda i: (i, 0)),
        ),
        compiler_params=pltpu.CompilerParams(
            # independent batch tiles -> megacore-shardable on v7x
            dimension_semantics=("parallel",),
            # explicit budget: ~9 MiB at tile_b=1024, ~17 MiB at 2048
            vmem_limit_bytes=32 * 1024 * 1024,
        ),
    )(x, params["w1"], params["b1"], params["w2"], params["b2"])

    logits = out[:B, :d_out]
    dist = out[:B, OUT_HALF:OUT_HALF + d_out]
    return dist, logits


def _reference(x, w1, b1, w2, b2):
    hi = jax.lax.Precision.HIGHEST
    h = _leaky_relu(jnp.dot(x, w1.T, precision=hi) + b1)
    logits = _leaky_relu(jnp.dot(h, w2.T, precision=hi) + b2)
    dist = jax.nn.softmax(logits, axis=1)
    return dist, logits


if __name__ == "__main__":
    # Module-default feature sizes; batch chosen so the grid has 2 steps.
    batch, d_in, hidden, d_out = 256, 28 * 28, 20, 10

    key = jax.random.PRNGKey(0)
    kx, k1, k2, k3, k4 = jax.random.split(key, 5)

    x = jax.random.normal(kx, (batch, d_in), dtype=jnp.float32)

    # Deterministic init mirroring _init_linear_weights: Normal(0, 0.03).
    sd = 0.03
    w1 = sd * jax.random.normal(k1, (hidden, d_in), dtype=jnp.float32)
    b1 = sd * jax.random.normal(k2, (hidden,), dtype=jnp.float32)
    w2 = sd * jax.random.normal(k3, (d_out, hidden), dtype=jnp.float32)
    b2 = sd * jax.random.normal(k4, (d_out,), dtype=jnp.float32)

    params = prepare_params(w1, b1, w2, b2)      # one-time prep, no per-call glue
    dist, logits = rsm_predictor_forward(x, params, tile_b=128)
    jax.block_until_ready((dist, logits))

    ref_dist, ref_logits = _reference(x, w1, b1, w2, b2)
    assert dist.shape == (batch, d_out) and logits.shape == (batch, d_out)
    # bf16 matmul operands (f32 accumulation) -> slightly looser tolerance.
    assert jnp.allclose(logits, ref_logits, atol=1e-2, rtol=1e-2)
    assert jnp.allclose(dist, ref_dist, atol=1e-2, rtol=1e-2)
    # exact softmax normalization in the kernel
    assert jnp.allclose(jnp.sum(dist, axis=1), 1.0, atol=1e-3)

    print("KERNEL_OK")
</pallas_src>

<mosaic_0001>
module attributes {stable_mosaic.version = 11 : i64} {
  func.func @_rsm_kernel(%arg0: i32, %arg1: memref<128x784xf32, #tpu.memory_space<vmem>>, %arg2: memref<784x128xbf16, #tpu.memory_space<vmem>>, %arg3: memref<1x128xf32, #tpu.memory_space<vmem>>, %arg4: memref<128x128xbf16, #tpu.memory_space<vmem>>, %arg5: memref<1x128xf32, #tpu.memory_space<vmem>>, %arg6: memref<128x128xf32, #tpu.memory_space<vmem>>) attributes {dimension_semantics = [#tpu.dimension_semantics<parallel>], iteration_bounds = array<i64: 2>, scalar_prefetch = 0 : i64, scratch_operands = 0 : i64, tpu.core_type = #tpu.core_type<tc>, window_params = [{transform_indices = @transform_0, window_bounds = array<i64: 128, 784>}, {pipeline_mode = #tpu.pipeline_mode<synchronous>, transform_indices = @transform_1, window_bounds = array<i64: 784, 128>}, {pipeline_mode = #tpu.pipeline_mode<synchronous>, transform_indices = @transform_2, window_bounds = array<i64: 1, 128>}, {pipeline_mode = #tpu.pipeline_mode<synchronous>, transform_indices = @transform_3, window_bounds = array<i64: 128, 128>}, {pipeline_mode = #tpu.pipeline_mode<synchronous>, transform_indices = @transform_4, window_bounds = array<i64: 1, 128>}, {transform_indices = @transform_5, window_bounds = array<i64: 128, 128>}]} {
    %c0 = arith.constant 0 : index
    %c0_0 = arith.constant 0 : index
    %0 = vector.load %arg1[%c0, %c0_0] : memref<128x784xf32, #tpu.memory_space<vmem>>, vector<128x784xf32>
    %1 = arith.truncf %0 : vector<128x784xf32> to vector<128x784xbf16>
    %c0_1 = arith.constant 0 : index
    %c0_2 = arith.constant 0 : index
    %2 = vector.load %arg2[%c0_1, %c0_2] : memref<784x128xbf16, #tpu.memory_space<vmem>>, vector<784x128xbf16>
    %cst = arith.constant dense<0.000000e+00> : vector<128x128xf32>
    %3 = tpu.matmul %1, %2, %cst {dimension_numbers = #tpu.dot_dimension_numbers<[1], [0], [0], [1], [0, 0, 1, 1], [], []>} : vector<128x784xbf16>, vector<784x128xbf16>, vector<128x128xf32> -> vector<128x128xf32>
    %c0_3 = arith.constant 0 : index
    %c0_4 = arith.constant 0 : index
    %4 = vector.load %arg3[%c0_3, %c0_4] : memref<1x128xf32, #tpu.memory_space<vmem>>, vector<1x128xf32>
    %5 = vector.broadcast %4 : vector<1x128xf32> to vector<128x128xf32>
    %6 = arith.addf %3, %5 : vector<128x128xf32>
    %cst_5 = arith.constant 0.000000e+00 : f32
    %7 = vector.broadcast %cst_5 : f32 to vector<128x128xf32>
    %8 = arith.cmpf oge, %6, %7 : vector<128x128xf32>
    %cst_6 = arith.constant 0.00999999977 : f32
    %9 = vector.broadcast %cst_6 : f32 to vector<128x128xf32>
    %10 = arith.mulf %9, %6 : vector<128x128xf32>
    %11 = arith.select %8, %6, %10 : vector<128x128xi1>, vector<128x128xf32>
    %12 = arith.truncf %11 : vector<128x128xf32> to vector<128x128xbf16>
    %c0_7 = arith.constant 0 : index
    %c0_8 = arith.constant 0 : index
    %13 = vector.load %arg4[%c0_7, %c0_8] : memref<128x128xbf16, #tpu.memory_space<vmem>>, vector<128x128xbf16>
    %cst_9 = arith.constant dense<0.000000e+00> : vector<128x128xf32>
    %14 = tpu.matmul %12, %13, %cst_9 {dimension_numbers = #tpu.dot_dimension_numbers<[1], [0], [0], [1], [0, 0, 1, 1], [], []>} : vector<128x128xbf16>, vector<128x128xbf16>, vector<128x128xf32> -> vector<128x128xf32>
    %c0_10 = arith.constant 0 : index
    %c0_11 = arith.constant 0 : index
    %15 = vector.load %arg5[%c0_10, %c0_11] : memref<1x128xf32, #tpu.memory_space<vmem>>, vector<1x128xf32>
    %16 = vector.broadcast %15 : vector<1x128xf32> to vector<128x128xf32>
    %17 = arith.addf %14, %16 : vector<128x128xf32>
    %cst_12 = arith.constant 0.000000e+00 : f32
    %18 = vector.broadcast %cst_12 : f32 to vector<128x128xf32>
    %19 = arith.cmpf oge, %17, %18 : vector<128x128xf32>
    %cst_13 = arith.constant 0.00999999977 : f32
    %20 = vector.broadcast %cst_13 : f32 to vector<128x128xf32>
    %21 = arith.mulf %20, %17 : vector<128x128xf32>
    %22 = arith.select %19, %17, %21 : vector<128x128xi1>, vector<128x128xf32>
    %23 = tpu.iota {dimensions = array<i32: 1>} : vector<128x128xi32>
    %c64_i32 = arith.constant 64 : i32
    %24 = vector.broadcast %c64_i32 : i32 to vector<128x128xi32>
    %25 = arith.cmpi sge, %23, %24 : vector<128x128xi32>
    %c74_i32 = arith.constant 74 : i32
    %26 = vector.broadcast %c74_i32 : i32 to vector<128x128xi32>
    %27 = arith.cmpi slt, %23, %26 : vector<128x128xi32>
    %28 = arith.andi %25, %27 : vector<128x128xi1>
    %cst_14 = arith.constant -1.000000e+30 : f32
    %29 = vector.broadcast %cst_14 : f32 to vector<128x128xf32>
    %30 = arith.select %28, %22, %29 : vector<128x128xi1>, vector<128x128xf32>
    %cst_15 = arith.constant dense<0xFF800000> : vector<128xf32>
    %31 = vector.multi_reduction <maximumf>, %30, %cst_15 [1] : vector<128x128xf32> to vector<128xf32>
    %32 = vector.shape_cast %31 : vector<128xf32> to vector<128x1xf32>
    %33 = vector.broadcast %32 : vector<128x1xf32> to vector<128x128xf32>
    %34 = arith.subf %30, %33 : vector<128x128xf32>
    %35 = math.exp %34 : vector<128x128xf32>
    %cst_16 = arith.constant dense<0.000000e+00> : vector<128xf32>
    %36 = vector.multi_reduction <add>, %35, %cst_16 [1] : vector<128x128xf32> to vector<128xf32>
    %37 = vector.shape_cast %36 : vector<128xf32> to vector<128x1xf32>
    %38 = vector.broadcast %37 : vector<128x1xf32> to vector<128x128xf32>
    %39 = arith.divf %35, %38 : vector<128x128xf32>
    %c64_i32_17 = arith.constant 64 : i32
    %40 = vector.broadcast %c64_i32_17 : i32 to vector<128x128xi32>
    %41 = arith.cmpi slt, %23, %40 : vector<128x128xi32>
    %42 = arith.select %41, %22, %39 : vector<128x128xi1>, vector<128x128xf32>
    %c0_18 = arith.constant 0 : index
    %c0_19 = arith.constant 0 : index
    %43 = vector.load %arg6[%c0_18, %c0_19] : memref<128x128xf32, #tpu.memory_space<vmem>>, vector<128x128xf32>
    tpu.vector_store %arg6[%c0_18, %c0_19], %42 {strides = array<i32>} : memref<128x128xf32, #tpu.memory_space<vmem>>, vector<128x128xf32>,
    return
  }
  func.func @transform_0(%arg0: i32) -> (i32, i32) {
    %c0_i32 = arith.constant 0 : i32
    %c0_i32_0 = arith.constant 0 : i32
    return %arg0, %c0_i32 : i32, i32
  }
  func.func @transform_1(%arg0: i32) -> (i32, i32) {
    %c0_i32 = arith.constant 0 : i32
    %c0_i32_0 = arith.constant 0 : i32
    %c0_i32_1 = arith.constant 0 : i32
    return %c0_i32, %c0_i32_0 : i32, i32
  }
  func.func @transform_2(%arg0: i32) -> (i32, i32) {
    %c0_i32 = arith.constant 0 : i32
    %c0_i32_0 = arith.constant 0 : i32
    %c0_i32_1 = arith.constant 0 : i32
    return %c0_i32, %c0_i32_0 : i32, i32
  }
  func.func @transform_3(%arg0: i32) -> (i32, i32) {
    %c0_i32 = arith.constant 0 : i32
    %c0_i32_0 = arith.constant 0 : i32
    %c0_i32_1 = arith.constant 0 : i32
    return %c0_i32, %c0_i32_0 : i32, i32
  }
  func.func @transform_4(%arg0: i32) -> (i32, i32) {
    %c0_i32 = arith.constant 0 : i32
    %c0_i32_0 = arith.constant 0 : i32
    %c0_i32_1 = arith.constant 0 : i32
    return %c0_i32, %c0_i32_0 : i32, i32
  }
  func.func @transform_5(%arg0: i32) -> (i32, i32) {
    %c0_i32 = arith.constant 0 : i32
    %c0_i32_0 = arith.constant 0 : i32
    return %arg0, %c0_i32 : i32, i32
  }
}

</mosaic_0001>

<bundles_post_ra>
// kernel: tpu_custom_call.1
= control target key start
LH: loop header
LB: loop body
LE: loop exit
PB: predicated region body
PF: predicated region fallthrough
CT: control target
= control target key end

     0   :  { %10 = vsyncpa [#allocation3], 0  ;;  %s3148_s0 = inlined_call_operand.vmem [shape: f32[256,784], index: 0, kind: input, shape index: {}]   ;;  %s3149_s1 = inlined_call_operand.vmem [shape: bf16[784,128], index: 1, kind: input, shape index: {}]   ;;  %s3150_s2 = inlined_call_operand.vmem [shape: f32[1,128], index: 2, kind: input, shape index: {}]   ;;  %s3151_s3 = inlined_call_operand.vmem [shape: bf16[128,128], index: 3, kind: input, shape index: {}]   ;;  %s3152_s4 = inlined_call_operand.vmem [shape: f32[1,128], index: 4, kind: input, shape index: {}]   ;;  %s3153_s5 = inlined_call_operand.hbm [shape: f32[256,128], index: 5, kind: output, shape index: {}]  }
   0x1   :  { %12 = vsyncpa [#allocation3 + $0x1], 0  ;;  %s2363_s18 = smov 0   ;;  %s2365_s19 = smov 0  }
   0x2   :  { %s2367_s20 = smov 0   ;;  %s2369_s21 = smov 0  }
   0x3 LB: > { %s2384_s22 = sadd.s32 4294967295, %s2328_s21   ;;  %s1756_s23 = sadd.s32 4294967294, %s2328_s21   ;;  %s2328_s21 = sphi %s2369_s21, %s3161_s21   ;;  %s2324_s20 = sphi %s2367_s20, %s3160_s20   ;;  %s2320_s19 = sphi %s2365_s19, %s3159_s19   ;;  %s2316_s18 = sphi %s2363_s18, %s3158_s18  }
   0x4   : > { %s2388_s24 = sadd.s32 1, %s2328_s21   ;;  %s135_s25 = sadd.s32 1, %s2324_s20 }
   0x5   : > { %s132_s26 = ssub.s32 %s2328_s21, %s2388_s24  ;;  %p145_p0 = scmp.ne.s32.totalorder %s2324_s20, %s2320_s19 }
   0x6   : > { %p133_p1 = scmp.eq.s32.totalorder %s132_s26, 0  ;;  %p146_p2 = scmp.eq.s32.totalorder %s2384_s22, 1 }
   0x7   : > { %p151_p3 = scmp.ne.s32.totalorder %s2320_s19, %s2316_s18  ;;  %p152_p4 = scmp.eq.s32.totalorder %s1756_s23, 1 }
   0x8   : > { %s2399_s27 = scalar_select %p133_p1, %s2324_s20, %s135_s25  }
   0x9   : > { %p2401_p5 = por %p146_p2, %p145_p0  ;;  %p2405_p6 = por %p152_p4, %p151_p3 }
   0xa   : > { %p1759_p7 = scmp.ge.s32.totalorder %s2328_s21, 1  ;;  %p192_p8 = scmp.lt.s32.totalorder %s2328_s21, 3 }
   0xc   : > { %p193_p9 = pnand %p1759_p7, %p192_p8 }
   0xd   : > { %v2145_v0 = vld [vmem:[%s3149_s1 + $0x40] sm:$0xff] (!%p193_p9)   ;;  %v2149_v4 = vld [vmem:[%s3149_s1 + $0x48] sm:$0xff] (!%p193_p9)   ;;  %v2153_v8 = vld [vmem:[%s3149_s1 + $0x50] sm:$0xff] (!%p193_p9)   ;;  %s1761_s17 = sshll.u32 (!%p193_p9), %s2384_s22, 4  ;;  %vm797_vm0 = vcmask (!%p193_p9), 130048   ;;  %s218_s25 = sand.u32 (!%p193_p9), 1, %s2320_s19  }
   0xe   : > { %196 = sbr.rel (%p193_p9) target bundleno = 945 (0x3b1), region = 40  ;;  %v2146_v1 = vld [vmem:[%s3149_s1] sm:$0xff] (!%p193_p9)   ;;  %1836 = vmatprep.subr.bf16.mxu0 (!%p193_p9), %v2145_v0  ;;  %v2150_v5 = vld [vmem:[%s3149_s1 + $0x8] sm:$0xff] (!%p193_p9)   ;;  %v2154_v9 = vld [vmem:[%s3149_s1 + $0x10] sm:$0xff] (!%p193_p9)   ;;  %p222_p10 = scmp.lt.s32.totalorder (!%p193_p9), %s1761_s17, 31 }
   0xf   : > { %v2147_v2 = vld [vmem:[%s3149_s1 + $0xc0] sm:$0xff] (!%p193_p9)   ;;  %1837 = vmatpush3.bf16.msra.mxu0 (!%p193_p9), %v2146_v1  ;;  %v2151_v6 = vld [vmem:[%s3149_s1 + $0xc8] sm:$0xff] (!%p193_p9)   ;;  %v2155_v10 = vld [vmem:[%s3149_s1 + $0xd0] sm:$0xff] (!%p193_p9)   ;;  %s1760_s30 = sshll.u32 (!%p193_p9), %s218_s25, 7  ;;  %s1835_s6 = sshll.u32 (!%p193_p9), %s2384_s22, 11 }
  0x10   : > { %v2148_v3 = vld [vmem:[%s3149_s1 + $0x80] sm:$0xff] (!%p193_p9)   ;;  %1900 = vmatprep.subr.bf16.mxu1 (!%p193_p9), %v2147_v2  ;;  %1838 = vmatprep.subr.bf16.mxu0 (!%p193_p9), %v2149_v4  ;;  %v2152_v7 = vld [vmem:[%s3149_s1 + $0x88] sm:$0xff] (!%p193_p9)   ;;  %v2156_v11 = vld [vmem:[%s3149_s1 + $0x90] sm:$0xff] (!%p193_p9)   ;;  %s3096_s22 = scalar_lea.hbm (!%p193_p9), %s3153_s5, %s1835_s6  ;;  %s3107_s10 = scalar_lea.sflag (!%p193_p9), [#allocation3], %s218_s25 }
  0x11   : > { %1901 = vmatpush3.bf16.msra.mxu1 (!%p193_p9), %v2148_v3  ;;  %v2157_v12 = vld [vmem:[%s3149_s1 + $0x58] sm:$0xff] (!%p193_p9)   ;;  %v2161_v16 = vld [vmem:[%s3149_s1 + $0x60] sm:$0xff] (!%p193_p9)   ;;  %v2165_v20 = vld [vmem:[%s3149_s1 + $0x68] sm:$0xff] (!%p193_p9)   ;;  %s2330_s12 = smov (!%p193_p9), [#allocation2]  }
  0x12   : > { %1902 = vmatprep.subr.bf16.mxu1 (!%p193_p9), %v2151_v6  ;;  %v2158_v13 = vld [vmem:[%s3149_s1 + $0x18] sm:$0xff] (!%p193_p9)   ;;  %v2162_v17 = vld [vmem:[%s3149_s1 + $0x20] sm:$0xff] (!%p193_p9)   ;;  %v2166_v21 = vld [vmem:[%s3149_s1 + $0x28] sm:$0xff] (!%p193_p9)   ;;  %s2270_s13 = sshll.u32 (!%p193_p9), %s2330_s12, 4  ;;  %s2271_s13 = int_to_ptr.vmem [resolvable:$false] %s2270_s13 }
  0x13   : > { %1839 = vmatpush3.bf16.msra.mxu0 (!%p193_p9), %v2150_v5  ;;  %v2159_v14 = vld [vmem:[%s3149_s1 + $0xd8] sm:$0xff] (!%p193_p9)   ;;  %v2163_v18 = vld [vmem:[%s3149_s1 + $0xe0] sm:$0xff] (!%p193_p9)   ;;  %v2167_v22 = vld [vmem:[%s3149_s1 + $0xe8] sm:$0xff] (!%p193_p9)   ;;  %s2272_s14 = scalar_lea.vmem (!%p193_p9), %s2271_s13, 4096 }
  0x14   : > { %1840 = vmatprep.subr.bf16.mxu0 (!%p193_p9), %v2153_v8  ;;  %v2160_v15 = vld [vmem:[%s3149_s1 + $0x98] sm:$0xff] (!%p193_p9)   ;;  %v2164_v19 = vld [vmem:[%s3149_s1 + $0xa0] sm:$0xff] (!%p193_p9)   ;;  %v2168_v23 = vld [vmem:[%s3149_s1 + $0xa8] sm:$0xff] (!%p193_p9)  }
  0x15   : > { %1903 = vmatpush3.bf16.msra.mxu1 %v2152_v7  ;;  %s3163_s17 = smov (!%p222_p10, %s1761_s17), 31  ;;  %v2169_v24 = vld [vmem:[%s3149_s1 + $0x70] sm:$0xff]   ;;  %v2173_v28 = vld [vmem:[%s3149_s1 + $0x78] sm:$0xff]   ;;  %v2177_v38 = vld [vmem:[%s3149_s1 + $0x140] sm:$0xff]  }
  0x16   : > { %1904 = vmatprep.subr.bf16.mxu1 %v2155_v10  ;;  %s2103_s9 = smul.u32 56, %s3163_s17  ;;  %v2170_v25 = vld [vmem:[%s3149_s1 + $0x30] sm:$0xff]   ;;  %v2174_v29 = vld [vmem:[%s3149_s1 + $0x38] sm:$0xff]   ;;  %v2178_v42 = vld [vmem:[%s3149_s1 + $0x100] sm:$0xff]  }
  0x17   : > { %1841 = vmatpush3.bf16.msra.mxu0 %v2154_v9  ;;  %v2171_v26 = vld [vmem:[%s3149_s1 + $0xf0] sm:$0xff]   ;;  %v2175_v30 = vld [vmem:[%s3149_s1 + $0xf8] sm:$0xff]   ;;  %v2179_v51 = vld [vmem:[%s3149_s1 + $0x148] sm:$0xff]  }
  0x18   : > { %1842 = vmatprep.subr.bf16.mxu0 %v2157_v12  ;;  %v2172_v27 = vld [vmem:[%s3149_s1 + $0xb0] sm:$0xff]   ;;  %s2502_s26 = scalar_lea.vmem %s3148_s0, %s2103_s9  ;;  %v2176_v34 = vld [vmem:[%s3149_s1 + $0xb8] sm:$0xff]   ;;  %v2180_v56 = vld [vmem:[%s3149_s1 + $0x108] sm:$0xff]  }
  0x19   : > { %1905 = vmatpush3.bf16.msra.mxu1 %v2156_v11  ;;  %v231_v31 = vld [vmem:[%s2502_s26 + $0x8] sm:$0xff]  ;;  %v238_v32 = vld [vmem:[%s2502_s26 + $0x40] sm:$0xff]  ;;  %v237_v36 = vld [vmem:[%s2502_s26 + $0x38] sm:$0xff] }
  0x1a   : > { %1906 = vmatprep.subr.bf16.mxu1 %v2159_v14  ;;  %v343_v33 = vpack.c.bf16 %v238_v32, %v231_v31  ;;  %v230_v35 = vld [vmem:[%s2502_s26] sm:$0xff]  ;;  %v233_v39 = vld [vmem:[%s2502_s26 + $0x18] sm:$0xff]  ;;  %v240_v40 = vld [vmem:[%s2502_s26 + $0x50] sm:$0xff] }
  0x1b   : > { %1843 = vmatpush3.bf16.msra.mxu0 %v2158_v13  ;;  %v342_v37 = vpack.c.bf16 %v237_v36, %v230_v35  ;;  %v345_v41 = vpack.c.bf16 %v240_v40, %v233_v39  ;;  %v232_v43 = vld [vmem:[%s2502_s26 + $0x10] sm:$0xff]  ;;  %v239_v44 = vld [vmem:[%s2502_s26 + $0x48] sm:$0xff]  ;;  %v245_v45 = vld [vmem:[%s2502_s26 + $0x78] sm:$0xff] }
  0x1c   : > { %1844 = vmatprep.subr.bf16.mxu0 %v2161_v16  ;;  %854 = vmatprep.mubr.bf16.mxu0 %v343_v33  ;;  %v344_v46 = vpack.c.bf16 %v239_v44, %v232_v43  ;;  %v252_v47 = vld [vmem:[%s2502_s26 + $0xb0] sm:$0xff]  ;;  %v251_v49 = vld [vmem:[%s2502_s26 + $0xa8] sm:$0xff]  ;;  %v254_v53 = vld [vmem:[%s2502_s26 + $0xc0] sm:$0xff] }
  0x1d   : > { %1907 = vmatpush3.bf16.msra.mxu1 %v2160_v15  ;;  %951 = vmatprep.mubr.bf16.mxu1 %v345_v41  ;;  %v244_v48 = vld [vmem:[%s2502_s26 + $0x70] sm:$0xff]  ;;  %v350_v50 = vpack.c.bf16 %v252_v47, %v245_v45  ;;  %v247_v52 = vld [vmem:[%s2502_s26 + $0x88] sm:$0xff]  ;;  %v246_v57 = vld [vmem:[%s2502_s26 + $0x80] sm:$0xff] }
  0x1e   : > { %1908 = vmatprep.subr.bf16.mxu1 %v2163_v18  ;;  %v349_v54 = vpack.c.bf16 %v251_v49, %v244_v48  ;;  %v352_v55 = vpack.c.bf16 %v254_v53, %v247_v52  ;;  %v253_v58 = vld [vmem:[%s2502_s26 + $0xb8] sm:$0xff]  ;;  %v259_v59 = vld [vmem:[%s2502_s26 + $0xe8] sm:$0xff]  ;;  %v266_v60 = vld [vmem:[%s2502_s26 + $0x120] sm:$0xff] }
  0x1f   : > { %1845 = vmatpush3.bf16.msra.mxu0 %v2162_v17  ;;  %v357_v61 = vpack.c.bf16 %v266_v60, %v259_v59  ;;  %v351_v62 = vpack.c.bf16 %v253_v58, %v246_v57  ;;  %v2181_v63 = vld [vmem:[%s3149_s1 + $0x150] sm:$0xff]   ;;  %v261_v0 = vld [vmem:[%s2502_s26 + $0xf8] sm:$0xff]  ;;  %v258_v2 = vld [vmem:[%s2502_s26 + $0xe0] sm:$0xff] }
  0x20   : > { %1846 = vmatprep.subr.bf16.mxu0 %v2165_v20  ;;  %v268_v1 = vld [vmem:[%s2502_s26 + $0x130] sm:$0xff]  ;;  %v265_v3 = vld [vmem:[%s2502_s26 + $0x118] sm:$0xff]  ;;  %v267_v9 = vld [vmem:[%s2502_s26 + $0x128] sm:$0xff] }
  0x21   : > { %1909 = vmatpush3.bf16.msra.mxu1 %v2164_v19  ;;  %v359_v4 = vpack.c.bf16 %v268_v1, %v261_v0  ;;  %v2182_v5 = vld [vmem:[%s3149_s1 + $0x110] sm:$0xff]   ;;  %v273_v7 = vld [vmem:[%s2502_s26 + $0x158] sm:$0xff]  ;;  %v356_v10 = vpack.c.bf16 %v265_v3, %v258_v2  ;;  %v275_v12 = vld [vmem:[%s2502_s26 + $0x168] sm:$0xff] }
  0x22   : > { %1910 = vmatprep.subr.bf16.mxu1 %v2167_v22  ;;  %v260_v6 = vld [vmem:[%s2502_s26 + $0xf0] sm:$0xff]  ;;  %v2183_v11 = vld [vmem:[%s3149_s1 + $0x158] sm:$0xff]   ;;  %v282_v13 = vld [vmem:[%s2502_s26 + $0x1a0] sm:$0xff] }
  0x23   : > { %1847 = vmatpush3.bf16.msra.mxu0 %v2166_v21  ;;  %v280_v8 = vld [vmem:[%s2502_s26 + $0x190] sm:$0xff]  ;;  %v2184_v15 = vld [vmem:[%s3149_s1 + $0x118] sm:$0xff]   ;;  %v358_v16 = vpack.c.bf16 %v267_v9, %v260_v6  ;;  %v366_v18 = vpack.c.bf16 %v282_v13, %v275_v12  ;;  %v2185_v19 = vld [vmem:[%s3149_s1 + $0x160] sm:$0xff]  }
  0x24   : > { %1848 = vmatprep.subr.bf16.mxu0 %v2169_v24  ;;  %v364_v14 = vpack.c.bf16 %v280_v8, %v273_v7  ;;  %v272_v17 = vld [vmem:[%s2502_s26 + $0x150] sm:$0xff]  ;;  %v279_v20 = vld [vmem:[%s2502_s26 + $0x188] sm:$0xff]  ;;  %v294_v22 = vld [vmem:[%s2502_s26 + $0x200] sm:$0xff] }
  0x25   : > { %1911 = vmatpush3.bf16.msra.mxu1 %v2168_v23  ;;  %v287_v21 = vld [vmem:[%s2502_s26 + $0x1c8] sm:$0xff]  ;;  %v2186_v23 = vld [vmem:[%s3149_s1 + $0x120] sm:$0xff]   ;;  %v363_v24 = vpack.c.bf16 %v279_v20, %v272_v17  ;;  %v293_v36 = vld [vmem:[%s2502_s26 + $0x1f8] sm:$0xff] }
  0x26   : > { %1912 = vmatprep.subr.bf16.mxu1 %v2171_v26  ;;  %v281_v26 = vld [vmem:[%s2502_s26 + $0x198] sm:$0xff]  ;;  %v2188_v31 = vld [vmem:[%s3149_s1 + $0x168] sm:$0xff]   ;;  %v286_v35 = vld [vmem:[%s2502_s26 + $0x1c0] sm:$0xff] }
  0x27   : > { %1849 = vmatpush3.bf16.msra.mxu0 %v2170_v25  ;;  %v274_v25 = vld [vmem:[%s2502_s26 + $0x160] sm:$0xff]  ;;  %v288_v39 = vld [vmem:[%s2502_s26 + $0x1d0] sm:$0xff]  ;;  %v295_v40 = vld [vmem:[%s2502_s26 + $0x208] sm:$0xff] }
  0x28   : > { %1850 = vmatprep.subr.bf16.mxu0 %v2173_v28  ;;  %v371_v28 = vpack.c.bf16 %v294_v22, %v287_v21  ;;  %v365_v32 = vpack.c.bf16 %v281_v26, %v274_v25  ;;  %v2190_v41 = vld [vmem:[%s3149_s1 + $0x170] sm:$0xff]   ;;  %v303_v45 = vld [vmem:[%s2502_s26 + $0x248] sm:$0xff]  ;;  %v372_v47 = vpack.c.bf16 %v295_v40, %v288_v39  ;;  %v2192_v48 = vld [vmem:[%s3149_s1 + $0x178] sm:$0xff]  }
  0x29   : > { %1913 = vmatpush3.bf16.msra.mxu1 %v2172_v27  ;;  %v2187_v27 = vld [vmem:[%s3149_s1 + $0x180] sm:$0xff]   ;;  %v2191_v43 = vld [vmem:[%s3149_s1 + $0x130] sm:$0xff]   ;;  %v2193_v52 = vld [vmem:[%s3149_s1 + $0x138] sm:$0xff]  }
  0x2a   : > { %1914 = vmatprep.subr.bf16.mxu1 %v2175_v30  ;;  %v296_v30 = vld [vmem:[%s2502_s26 + $0x210] sm:$0xff]  ;;  %v315_v53 = vld [vmem:[%s2502_s26 + $0x2a8] sm:$0xff]  ;;  %v309_v57 = vld [vmem:[%s2502_s26 + $0x278] sm:$0xff] }
  0x2b   : > { %1851 = vmatpush3.bf16.msra.mxu0 %v2174_v29  ;;  %v289_v29 = vld [vmem:[%s2502_s26 + $0x1d8] sm:$0xff]  ;;  %v300_v49 = vld [vmem:[%s2502_s26 + $0x230] sm:$0xff]  ;;  %v331_v7 = vld [vmem:[%s2502_s26 + $0x328] sm:$0xff] }
  0x2c   : > { %1964 = vmatprep.subr.bf16.mxu0 %v2177_v38  ;;  %v373_v33 = vpack.c.bf16 %v296_v30, %v289_v29  ;;  %v308_v38 = vld [vmem:[%s2502_s26 + $0x270] sm:$0xff]  ;;  %v317_v59 = vld [vmem:[%s2502_s26 + $0x2b8] sm:$0xff]  ;;  %v338_v8 = vld [vmem:[%s2502_s26 + $0x360] sm:$0xff] }
  0x2d   : > { %1915 = vmatpush3.bf16.msra.mxu1 %v2176_v34  ;;  %v2189_v34 = vld [vmem:[%s3149_s1 + $0x128] sm:$0xff]   ;;  %v324_v60 = vld [vmem:[%s2502_s26 + $0x2f0] sm:$0xff]  ;;  %v321_v0 = vld [vmem:[%s2502_s26 + $0x2d8] sm:$0xff] }
  0x2e   : > { %855 = vmatmul.mubr.bf16.vlgmr.msra.gmra.mrb[0].mxu0 %v342_v37  ;;  %2053 = vmatprep.subr.bf16.mxu1 %v2187_v27  ;;  %v301_v37 = vld [vmem:[%s2502_s26 + $0x238] sm:$0xff]  ;;  %v336_v2 = vld [vmem:[%s2502_s26 + $0x350] sm:$0xff]  ;;  %v335_v12 = vld [vmem:[%s2502_s26 + $0x348] sm:$0xff] }
  0x2f   : > { %1965 = vmatpush3.bf16.msra.mxu0 %v2178_v42  ;;  %862 = vmatprep.mubr.bf16.mxu0 %v350_v50  ;;  %v370_v42 = vpack.c.bf16 %v293_v36, %v286_v35  ;;  %v378_v44 = vpack.c.bf16 %v308_v38, %v301_v37  ;;  %v329_v1 = vld [vmem:[%s2502_s26 + $0x318] sm:$0xff]  ;;  %v235_v13 = vld [vmem:[%s2502_s26 + $0x28] sm:$0xff]  ;;  %v236_v17 = vld [vmem:[%s2502_s26 + $0x30] sm:$0xff] }
  0x30   : > { %952 = vmatmul.mubr.bf16.vlgmr.msra.gmra.mrb[0].mxu1 %v344_v46  ;;  %1966 = vmatprep.subr.bf16.mxu0 %v2179_v51  ;;  %v310_v46 = vld [vmem:[%s2502_s26 + $0x280] sm:$0xff]  ;;  %v307_v51 = vld [vmem:[%s2502_s26 + $0x268] sm:$0xff]  ;;  %v392_v6 = vpack.c.bf16 %v336_v2, %v329_v1  ;;  %v249_v25 = vld [vmem:[%s2502_s26 + $0x98] sm:$0xff] }
  0x31   : > { %959 = vmatprep.mubr.bf16.mxu1 %v352_v55  ;;  %2054 = vmatpush3.bf16.msra.mxu1 %v2187_v27  ;;  %v380_v50 = vpack.c.bf16 %v310_v46, %v303_v45  ;;  %v377_v55 = vpack.c.bf16 %v307_v51, %v300_v49  ;;  %v256_v26 = vld [vmem:[%s2502_s26 + $0xd0] sm:$0xff]  ;;  %v257_v29 = vld [vmem:[%s2502_s26 + $0xd8] sm:$0xff]  ;;  %v255_v36 = vld [vmem:[%s2502_s26 + $0xc8] sm:$0xff] }
  0x32   : > { %v354_v30 = vpack.c.bf16 %v256_v26, %v249_v25  ;;  %v248_v35 = vld [vmem:[%s2502_s26 + $0x90] sm:$0xff]  ;;  %v263_v37 = vld [vmem:[%s2502_s26 + $0x108] sm:$0xff]  ;;  %v270_v38 = vld [vmem:[%s2502_s26 + $0x140] sm:$0xff] }
  0x33   : > { %1967 = vmatpush3.bf16.msra.mxu0 %v2180_v56  ;;  %v302_v56 = vld [vmem:[%s2502_s26 + $0x240] sm:$0xff]  ;;  %v353_v39 = vpack.c.bf16 %v255_v36, %v248_v35  ;;  %v277_v49 = vld [vmem:[%s2502_s26 + $0x178] sm:$0xff]  ;;  %v2195_v26 = vld [vmem:[%s3151_s3 + $0x8] sm:$0xff]  }
  0x34   : > { %1968 = vmatprep.subr.bf16.mxu0 %v2181_v63  ;;  %v314_v63 = vld [vmem:[%s2502_s26 + $0x2a0] sm:$0xff]  ;;  %v341_v1 = vld [vmem:[%s2502_s26 + $0x378] sm:$0xff] }
  0x35   : > { %v384_v3 = vpack.c.bf16 %v321_v0, %v314_v63  ;;  %v278_v40 = vld [vmem:[%s2502_s26 + $0x180] sm:$0xff] }
  0x36   : > { %863 = vmatmul.mubr.bf16.gmra.mrb[4].mxu0 %v349_v54  ;;  %v322_v54 = vld [vmem:[%s2502_s26 + $0x2e0] sm:$0xff] }
  0x37   : > { %870 = vmatprep.mubr.bf16.mxu0 %v357_v61  ;;  %1969 = vmatpush3.bf16.msra.mxu0 %v2182_v5  ;;  %v385_v58 = vpack.c.bf16 %v322_v54, %v315_v53  ;;  %v379_v61 = vpack.c.bf16 %v309_v57, %v302_v56  ;;  %v323_v5 = vld [vmem:[%s2502_s26 + $0x2e8] sm:$0xff]  ;;  %v313_v53 = vld [vmem:[%s2502_s26 + $0x298] sm:$0xff]  ;;  %v334_v0 = vld [vmem:[%s2502_s26 + $0x340] sm:$0xff] }
  0x38   : > { %960 = vmatmul.mubr.bf16.gmra.mrb[4].mxu1 %v351_v62  ;;  %1970 = vmatprep.subr.bf16.mxu0 %v2183_v11  ;;  %v387_v62 = vpack.c.bf16 %v324_v60, %v317_v59  ;;  %v328_v11 = vld [vmem:[%s2502_s26 + $0x310] sm:$0xff]  ;;  %v327_v56 = vld [vmem:[%s2502_s26 + $0x308] sm:$0xff]  ;;  %v2194_v25 = vld [vmem:[%s3151_s3] sm:$0xff]  }
  0x39   : > { %967 = vmatprep.mubr.bf16.mxu1 %v359_v4  ;;  %v316_v4 = vld [vmem:[%s2502_s26 + $0x2b0] sm:$0xff]  ;;  %v283_v60 = vld [vmem:[%s2502_s26 + $0x1a8] sm:$0xff]  ;;  %2071 = vmatprep.subr.bf16.mxu1 %v2194_v25 }
  0x3a   : > { %v386_v9 = vpack.c.bf16 %v323_v5, %v316_v4  ;;  %v276_v59 = vld [vmem:[%s2502_s26 + $0x170] sm:$0xff]  ;;  %v290_v4 = vld [vmem:[%s2502_s26 + $0x1e0] sm:$0xff]  ;;  %v297_v5 = vld [vmem:[%s2502_s26 + $0x218] sm:$0xff] }
  0x3b   : > { %1971 = vmatpush3.bf16.msra.mxu0 %v2184_v15  ;;  %v337_v15 = vld [vmem:[%s2502_s26 + $0x358] sm:$0xff]  ;;  %v367_v63 = vpack.c.bf16 %v283_v60, %v276_v59 }
  0x3c   : > { %1972 = vmatprep.subr.bf16.mxu0 %v2185_v19  ;;  %v391_v19 = vpack.c.bf16 %v335_v12, %v328_v11  ;;  %v311_v11 = vld [vmem:[%s2502_s26 + $0x288] sm:$0xff] }
  0x3d   : > { %v319_v12 = vld [vmem:[%s2502_s26 + $0x2c8] sm:$0xff] }
  0x3e   : > { %871 = vmatmul.mubr.bf16.gmra.mrb[8].mxu0 %v356_v10  ;;  %v394_v10 = vpack.c.bf16 %v338_v8, %v331_v7  ;;  %v312_v7 = vld [vmem:[%s2502_s26 + $0x290] sm:$0xff]  ;;  %v374_v8 = vpack.c.bf16 %v297_v5, %v290_v4 }
  0x3f   : > { %878 = vmatprep.mubr.bf16.mxu0 %v364_v14  ;;  %1973 = vmatpush3.bf16.msra.mxu0 %v2186_v23  ;;  %v330_v14 = vld [vmem:[%s2502_s26 + $0x320] sm:$0xff] }
  0x40   : > { %968 = vmatmul.mubr.bf16.gmra.mrb[8].mxu1 %v358_v16  ;;  %1974 = vmatprep.subr.bf16.mxu0 %v2188_v31  ;;  %v242_v16 = vld [vmem:[%s2502_s26 + $0x60] sm:$0xff]  ;;  %v393_v21 = vpack.c.bf16 %v337_v15, %v330_v14  ;;  %v264_v31 = vld [vmem:[%s2502_s26 + $0x110] sm:$0xff] }
  0x41   : > { %975 = vmatprep.mubr.bf16.mxu1 %v366_v18  ;;  %v243_v18 = vld [vmem:[%s2502_s26 + $0x68] sm:$0xff]  ;;  %v347_v20 = vpack.c.bf16 %v242_v16, %v235_v13  ;;  %v234_v23 = vld [vmem:[%s2502_s26 + $0x20] sm:$0xff] }
  0x42   : > { %v348_v22 = vpack.c.bf16 %v243_v18, %v236_v17  ;;  %v326_v13 = vld [vmem:[%s2502_s26 + $0x300] sm:$0xff]  ;;  %v325_v17 = vld [vmem:[%s2502_s26 + $0x2f8] sm:$0xff] }
  0x43   : > { %1975 = vmatpush3.bf16.msra.mxu0 %v2189_v34  ;;  %v389_v15 = vpack.c.bf16 %v326_v13, %v319_v12  ;;  %v318_v16 = vld [vmem:[%s2502_s26 + $0x2c0] sm:$0xff]  ;;  %v333_v18 = vld [vmem:[%s2502_s26 + $0x338] sm:$0xff] }
  0x44   : > { %1976 = vmatprep.subr.bf16.mxu0 %v2190_v41  ;;  %v285_v41 = vld [vmem:[%s2502_s26 + $0x1b8] sm:$0xff] }
  0x45   : > { %v369_v45 = vpack.c.bf16 %v285_v41, %v278_v40 }
  0x46   : > { %879 = vmatmul.mubr.bf16.gmra.mrb[12].mxu0 %v363_v24  ;;  %v241_v24 = vld [vmem:[%s2502_s26 + $0x58] sm:$0xff] }
  0x47   : > { %886 = vmatprep.mubr.bf16.mxu0 %v371_v28  ;;  %1977 = vmatpush3.bf16.msra.mxu0 %v2191_v43  ;;  %v346_v27 = vpack.c.bf16 %v241_v24, %v234_v23  ;;  %v250_v28 = vld [vmem:[%s2502_s26 + $0xa0] sm:$0xff]  ;;  %v292_v43 = vld [vmem:[%s2502_s26 + $0x1f0] sm:$0xff]  ;;  %v339_v23 = vld [vmem:[%s2502_s26 + $0x368] sm:$0xff] }
  0x48   : > { %976 = vmatmul.mubr.bf16.gmra.mrb[12].mxu1 %v365_v32  ;;  %1978 = vmatprep.subr.bf16.mxu0 %v2192_v48  ;;  %v271_v32 = vld [vmem:[%s2502_s26 + $0x148] sm:$0xff]  ;;  %v269_v48 = vld [vmem:[%s2502_s26 + $0x138] sm:$0xff] }
  0x49   : > { %983 = vmatprep.mubr.bf16.mxu1 %v373_v33  ;;  %v355_v33 = vpack.c.bf16 %v257_v29, %v250_v28  ;;  %v362_v34 = vpack.c.bf16 %v271_v32, %v264_v31  ;;  %v2197_v28 = vld [vmem:[%s3151_s3 + $0x18] sm:$0xff]   ;;  %v2198_v29 = vld [vmem:[%s3151_s3 + $0x20] sm:$0xff]   ;;  %v2200_v31 = vld [vmem:[%s3151_s3 + $0x30] sm:$0xff]  }
  0x4a   : > { %v2201_v32 = vld [vmem:[%s3151_s3 + $0x38] sm:$0xff]  }
  0x4b   : > { %1979 = vmatpush3.bf16.msra.mxu0 %v2193_v52  ;;  %v306_v52 = vld [vmem:[%s2502_s26 + $0x260] sm:$0xff] }
  0x4c   : > { %v383_v57 = vpack.c.bf16 %v313_v53, %v306_v52 }
  0x4e   : > { %887 = vmatmul.mubr.bf16.gmra.mrb[16].mxu0 %v370_v42  ;;  %v361_v42 = vpack.c.bf16 %v270_v38, %v263_v37 }
  0x4f   : > { %894 = vmatprep.mubr.bf16.mxu0 %v378_v44  ;;  %v299_v44 = vld [vmem:[%s2502_s26 + $0x228] sm:$0xff] }
  0x50   : > { %984 = vmatmul.mubr.bf16.gmra.mrb[16].mxu1 %v372_v47  ;;  %v376_v46 = vpack.c.bf16 %v299_v44, %v292_v43  ;;  %v262_v47 = vld [vmem:[%s2502_s26 + $0x100] sm:$0xff] }
  0x51   : > { %991 = vmatprep.mubr.bf16.mxu1 %v380_v50  ;;  %v284_v50 = vld [vmem:[%s2502_s26 + $0x1b0] sm:$0xff]  ;;  %v360_v51 = vpack.c.bf16 %v269_v48, %v262_v47 }
  0x52   : > { %v368_v54 = vpack.c.bf16 %v284_v50, %v277_v49 }
  0x56   : > { %895 = vmatmul.mubr.bf16.gmra.mrb[20].mxu0 %v377_v55  ;;  %v320_v55 = vld [vmem:[%s2502_s26 + $0x2d0] sm:$0xff] }
  0x57   : > { %902 = vmatprep.mubr.bf16.mxu0 %v385_v58  ;;  %v390_v58 = vpack.c.bf16 %v327_v56, %v320_v55 }
  0x58   : > { %992 = vmatmul.mubr.bf16.gmra.mrb[20].mxu1 %v379_v61  ;;  %v291_v61 = vld [vmem:[%s2502_s26 + $0x1e8] sm:$0xff] }
  0x59   : > { %999 = vmatprep.mubr.bf16.mxu1 %v387_v62  ;;  %v298_v62 = vld [vmem:[%s2502_s26 + $0x220] sm:$0xff] }
  0x5a   : > { %v375_v2 = vpack.c.bf16 %v298_v62, %v291_v61 }
  0x5e   : > { %903 = vmatmul.mubr.bf16.gmra.mrb[24].mxu0 %v384_v3  ;;  %v397_v3 = vpack.c.bf16 %v341_v1, %v334_v0 }
  0x5f   : > { %910 = vmatprep.mubr.bf16.mxu0 %v392_v6  ;;  %v305_v6 = vld [vmem:[%s2502_s26 + $0x258] sm:$0xff] }
  0x60   : > { %1000 = vmatmul.mubr.bf16.gmra.mrb[24].mxu1 %v386_v9  ;;  %v382_v9 = vpack.c.bf16 %v312_v7, %v305_v6 }
  0x61   : > { %1007 = vmatprep.mubr.bf16.mxu1 %v394_v10  ;;  %v304_v10 = vld [vmem:[%s2502_s26 + $0x250] sm:$0xff] }
  0x62   : > { %v381_v14 = vpack.c.bf16 %v311_v11, %v304_v10 }
  0x66   : > { %911 = vmatmul.mubr.bf16.gmra.mrb[28].mxu0 %v391_v19  ;;  %v340_v19 = vld [vmem:[%s2502_s26 + $0x370] sm:$0xff] }
  0x67   : > { %1048 = vmatprep.mubr.bf16.mxu0 %v347_v20  ;;  %v388_v20 = vpack.c.bf16 %v325_v17, %v318_v16 }
  0x68   : > { %1008 = vmatmul.mubr.bf16.gmra.mrb[28].mxu1 %v393_v21  ;;  %v396_v21 = vpack.c.bf16 %v340_v19, %v333_v18 }
  0x69   : > { %2055 = vmatprep.mubr.msk.bf16.mxu1 %vm797_vm0, %v348_v22  ;;  %v332_v22 = vld [vmem:[%s2502_s26 + $0x330] sm:$0xff]  ;;  %s3018_s26 = scalar_lea.vmem [#allocation2], %s1760_s30 }
  0x6a   : > { %v395_v24 = vpack.c.bf16 %v339_v23, %v332_v22  ;;  %s1694_s7 = sshll.u32 %s3018_s26, 4  ;;  %s3098_s7 = int_to_ptr.vmem [resolvable:$true] %s1694_s7 }
  0x6b   : > { %s2266_s11 = scalar_lea.vmem %s3098_s7, 2048  ;;  %p2273_p0 = scmp.lt.s32.totalorder %s3098_s7, %s2271_s13 }
  0x6c   : > { %p2267_p11 = scmp.ne.s32.totalorder %s3098_s7, %s2266_s11  ;;  %p2274_p1 = scmp.lt.s32.totalorder %s2272_s14, %s2266_s11 }
  0x6e   : > { %1049 = vmatmul.mubr.bf16.vlgmr.msra.gmra.mrb[32].mxu0 %v346_v27  ;;  %v2196_v27 = vld [vmem:[%s3151_s3 + $0x10] sm:$0xff]   ;;  %p2268_p12 = pnand %p2267_p11, %p2401_p5  ;;  %p2275_p2 = por %p2274_p1, %p2273_p0 }
  0x6f   : > { %1056 = vmatprep.mubr.bf16.mxu0 %v354_v30  ;;  %v2199_v30 = vld [vmem:[%s3151_s3 + $0x28] sm:$0xff]  }
  0x70   : > { %2056 = vmatmul.mubr.msk.bf16.vlgmr.msra.gmra.mrb[32].mxu1 %vm797_vm0, %v355_v33  ;;  %p2269_p13 = pneg %p2268_p12 }
  0x71   : > { %2059 = vmatprep.mubr.msk.bf16.mxu1 %vm797_vm0, %v362_v34  ;;  %2072 = vmatpush3.bf16.msra.mxu1 %v2194_v25  ;;  %v2711_v34 = vld [vmem:[%s3150_s2] ss:$0 sm:$0xff] }
  0x72   : > { %2073 = vmatprep.subr.bf16.mxu1 %v2195_v26  ;;  %p2276_p3 = pnand %p2275_p2, %p2269_p13 }
  0x75   : > { %2074 = vmatpush3.bf16.msra.mxu1 %v2195_v26 }
  0x76   : > { %1057 = vmatmul.mubr.bf16.gmra.mrb[36].mxu0 %v353_v39  ;;  %2075 = vmatprep.subr.bf16.mxu1 %v2196_v27 }
  0x77   : > { %1064 = vmatprep.mubr.bf16.mxu0 %v361_v42 }
  0x78   : > { %2060 = vmatmul.mubr.msk.bf16.gmra.mrb[36].mxu1 %vm797_vm0, %v369_v45 }
  0x79   : > { %2063 = vmatprep.mubr.msk.bf16.mxu1 %vm797_vm0, %v376_v46  ;;  %2076 = vmatpush3.bf16.msra.mxu1 %v2196_v27 }
  0x7a   : > { %2077 = vmatprep.subr.bf16.mxu1 %v2197_v28 }
  0x7d   : > { %2078 = vmatpush3.bf16.msra.mxu1 %v2197_v28 }
  0x7e   : > { %1065 = vmatmul.mubr.bf16.gmra.mrb[40].mxu0 %v360_v51  ;;  %2079 = vmatprep.subr.bf16.mxu1 %v2198_v29 }
  0x7f   : > { %1072 = vmatprep.mubr.bf16.mxu0 %v368_v54 }
  0x80   : > { %2064 = vmatmul.mubr.msk.bf16.gmra.mrb[40].mxu1 %vm797_vm0, %v383_v57 }
  0x81   : > { %2067 = vmatprep.mubr.msk.bf16.mxu1 %vm797_vm0, %v390_v58  ;;  %2080 = vmatpush3.bf16.msra.mxu1 %v2198_v29 }
  0x82   : > { %2081 = vmatprep.subr.bf16.mxu1 %v2199_v30 }
  0x85   : > { %2082 = vmatpush3.bf16.msra.mxu1 %v2199_v30 }
  0x86   : > { %1073 = vmatmul.mubr.bf16.gmra.mrb[44].mxu0 %v367_v63  ;;  %2083 = vmatprep.subr.bf16.mxu1 %v2200_v31 }
  0x87   : > { %1080 = vmatprep.mubr.bf16.mxu0 %v375_v2 }
  0x88   : > { %2068 = vmatmul.mubr.msk.bf16.gmra.mrb[44].mxu1 %vm797_vm0, %v397_v3 }
  0x89   : > { %2084 = vmatpush3.bf16.msra.mxu1 %v2200_v31 }
  0x8a   : > { %2085 = vmatprep.subr.bf16.mxu1 %v2201_v32 }
  0x8d   : > { %2086 = vmatpush3.bf16.msra.mxu1 %v2201_v32 }
  0x8e   : > { %1081 = vmatmul.mubr.bf16.gmra.mrb[48].mxu0 %v374_v8 }
  0x8f   : > { %1088 = vmatprep.mubr.bf16.mxu0 %v382_v9 }
  0x96   : > { %1089 = vmatmul.mubr.bf16.gmra.mrb[52].mxu0 %v381_v14 }
  0x97   : > { %1096 = vmatprep.mubr.bf16.mxu0 %v389_v15 }
  0x9e   : > { %1097 = vmatmul.mubr.bf16.gmra.mrb[56].mxu0 %v388_v20 }
  0x9f   : > { %1104 = vmatprep.mubr.bf16.mxu0 %v396_v21 }
  0xa6   : > { %1105 = vmatmul.mubr.bf16.gmra.mrb[60].mxu0 %v395_v24 }
 0x101   : > { %v1852_v33 = vpop.f32.mrb[0].mxu0 }
 0x102   : > { %v1853_v35 = vpop.f32.mrb[1].mxu0 }
 0x103   : > { %v1854_v36 = vadd.f32 %v1853_v35, %v1852_v33  ;;  %v1855_v37 = vpop.f32.mrb[2].mxu0  ;;  %v1916_v38 = vpop.f32.mrb[0].mxu1 }
 0x104   : > { %v1856_v39 = vpop.f32.mrb[3].mxu0  ;;  %v1917_v42 = vpop.f32.mrb[1].mxu1 }
 0x105   : > { %v857_v40 = vadd.f32 %v1854_v36, %v2711_v34  ;;  %v1857_v41 = vadd.f32 %v1856_v39, %v1855_v37  ;;  %v1918_v43 = vadd.f32 %v1917_v42, %v1916_v38  ;;  %v1919_v44 = vpop.f32.mrb[2].mxu1 }
 0x106   : > { %v1920_v46 = vpop.f32.mrb[3].mxu1 }
 0x107   : > { %v860_v45 = vadd.f32 %v1857_v41, %v2711_v34  ;;  %v2715_v47 = vadd.f32 %v1918_v43, %v857_v40  ;;  %v1921_v48 = vadd.f32 %v1920_v46, %v1919_v44 }
 0x109   : > { %v1858_v49 = vpop.f32.mrb[4].mxu0  ;;  %v2717_v50 = vadd.f32 %v1921_v48, %v860_v45 }
 0x10a   : > { %v1859_v51 = vpop.f32.mrb[5].mxu0 }
 0x10b   : > { %v1860_v52 = vadd.f32 %v1859_v51, %v1858_v49  ;;  %v1861_v53 = vpop.f32.mrb[6].mxu0  ;;  %v1922_v54 = vpop.f32.mrb[4].mxu1 }
 0x10c   : > { %v1862_v55 = vpop.f32.mrb[7].mxu0  ;;  %v1923_v58 = vpop.f32.mrb[5].mxu1 }
 0x10d   : > { %v865_v56 = vadd.f32 %v1860_v52, %v2711_v34  ;;  %v1863_v57 = vadd.f32 %v1862_v55, %v1861_v53  ;;  %v1924_v59 = vadd.f32 %v1923_v58, %v1922_v54  ;;  %v1925_v60 = vpop.f32.mrb[6].mxu1 }
 0x10e   : > { %v1926_v62 = vpop.f32.mrb[7].mxu1 }
 0x10f   : > { %v868_v61 = vadd.f32 %v1863_v57, %v2711_v34  ;;  %v2721_v63 = vadd.f32 %v1924_v59, %v865_v56  ;;  %v1927_v0 = vadd.f32 %v1926_v62, %v1925_v60 }
 0x111   : > { %v1864_v1 = vpop.f32.mrb[8].mxu0  ;;  %v2723_v2 = vadd.f32 %v1927_v0, %v868_v61 }
 0x112   : > { %v1865_v3 = vpop.f32.mrb[9].mxu0 }
 0x113   : > { %v1866_v4 = vadd.f32 %v1865_v3, %v1864_v1  ;;  %v1867_v5 = vpop.f32.mrb[10].mxu0  ;;  %v1928_v6 = vpop.f32.mrb[8].mxu1 }
 0x114   : > { %v1868_v7 = vpop.f32.mrb[11].mxu0  ;;  %v1929_v10 = vpop.f32.mrb[9].mxu1 }
 0x115   : > { %v873_v8 = vadd.f32 %v1866_v4, %v2711_v34  ;;  %v1869_v9 = vadd.f32 %v1868_v7, %v1867_v5  ;;  %v1930_v11 = vadd.f32 %v1929_v10, %v1928_v6  ;;  %v1931_v12 = vpop.f32.mrb[10].mxu1 }
 0x116   : > { %v1932_v14 = vpop.f32.mrb[11].mxu1 }
 0x117   : > { %v876_v13 = vadd.f32 %v1869_v9, %v2711_v34  ;;  %v2727_v15 = vadd.f32 %v1930_v11, %v873_v8  ;;  %v1933_v16 = vadd.f32 %v1932_v14, %v1931_v12 }
 0x119   : > { %v1870_v17 = vpop.f32.mrb[12].mxu0  ;;  %v2729_v18 = vadd.f32 %v1933_v16, %v876_v13 }
 0x11a   : > { %v1871_v19 = vpop.f32.mrb[13].mxu0 }
 0x11b   : > { %v1872_v20 = vadd.f32 %v1871_v19, %v1870_v17  ;;  %v1873_v21 = vpop.f32.mrb[14].mxu0  ;;  %v1934_v22 = vpop.f32.mrb[12].mxu1 }
 0x11c   : > { %v1874_v23 = vpop.f32.mrb[15].mxu0  ;;  %v1935_v26 = vpop.f32.mrb[13].mxu1 }
 0x11d   : > { %v881_v24 = vadd.f32 %v1872_v20, %v2711_v34  ;;  %v1875_v25 = vadd.f32 %v1874_v23, %v1873_v21  ;;  %v1936_v27 = vadd.f32 %v1935_v26, %v1934_v22  ;;  %v1937_v28 = vpop.f32.mrb[14].mxu1 }
 0x11e   : > { %v1938_v30 = vpop.f32.mrb[15].mxu1 }
 0x11f   : > { %v884_v29 = vadd.f32 %v1875_v25, %v2711_v34  ;;  %v2733_v31 = vadd.f32 %v1936_v27, %v881_v24  ;;  %v1939_v32 = vadd.f32 %v1938_v30, %v1937_v28 }
 0x121   : > { %v1876_v33 = vpop.f32.mrb[16].mxu0  ;;  %v2735_v35 = vadd.f32 %v1939_v32, %v884_v29 }
 0x122   : > { %v1877_v36 = vpop.f32.mrb[17].mxu0 }
 0x123   : > { %v1878_v37 = vadd.f32 %v1877_v36, %v1876_v33  ;;  %v1879_v38 = vpop.f32.mrb[18].mxu0  ;;  %v1940_v39 = vpop.f32.mrb[16].mxu1 }
 0x124   : > { %v1880_v40 = vpop.f32.mrb[19].mxu0  ;;  %v1941_v43 = vpop.f32.mrb[17].mxu1 }
 0x125   : > { %v889_v41 = vadd.f32 %v1878_v37, %v2711_v34  ;;  %v1881_v42 = vadd.f32 %v1880_v40, %v1879_v38  ;;  %v1942_v44 = vadd.f32 %v1941_v43, %v1940_v39  ;;  %v1943_v45 = vpop.f32.mrb[18].mxu1 }
 0x126   : > { %v1944_v48 = vpop.f32.mrb[19].mxu1 }
 0x127   : > { %v892_v46 = vadd.f32 %v1881_v42, %v2711_v34  ;;  %v2739_v49 = vadd.f32 %v1942_v44, %v889_v41  ;;  %v1945_v51 = vadd.f32 %v1944_v48, %v1943_v45 }
 0x129   : > { %v1882_v52 = vpop.f32.mrb[20].mxu0  ;;  %v2741_v53 = vadd.f32 %v1945_v51, %v892_v46 }
 0x12a   : > { %v1883_v54 = vpop.f32.mrb[21].mxu0 }
 0x12b   : > { %v1884_v55 = vadd.f32 %v1883_v54, %v1882_v52  ;;  %v1885_v56 = vpop.f32.mrb[22].mxu0  ;;  %v1946_v57 = vpop.f32.mrb[20].mxu1 }
 0x12c   : > { %v1886_v58 = vpop.f32.mrb[23].mxu0  ;;  %v1947_v61 = vpop.f32.mrb[21].mxu1 }
 0x12d   : > { %v897_v59 = vadd.f32 %v1884_v55, %v2711_v34  ;;  %v1887_v60 = vadd.f32 %v1886_v58, %v1885_v56  ;;  %v1948_v62 = vadd.f32 %v1947_v61, %v1946_v57  ;;  %v1949_v0 = vpop.f32.mrb[22].mxu1 }
 0x12e   : > { %v1950_v3 = vpop.f32.mrb[23].mxu1 }
 0x12f   : > { %v900_v1 = vadd.f32 %v1887_v60, %v2711_v34  ;;  %v2745_v4 = vadd.f32 %v1948_v62, %v897_v59  ;;  %v1951_v5 = vadd.f32 %v1950_v3, %v1949_v0 }
 0x131   : > { %v1888_v6 = vpop.f32.mrb[24].mxu0  ;;  %v2747_v7 = vadd.f32 %v1951_v5, %v900_v1 }
 0x132   : > { %v1889_v8 = vpop.f32.mrb[25].mxu0 }
 0x133   : > { %v1890_v9 = vadd.f32 %v1889_v8, %v1888_v6  ;;  %v1891_v10 = vpop.f32.mrb[26].mxu0  ;;  %v1952_v11 = vpop.f32.mrb[24].mxu1 }
 0x134   : > { %v1892_v12 = vpop.f32.mrb[27].mxu0  ;;  %v1953_v16 = vpop.f32.mrb[25].mxu1 }
 0x135   : > { %v905_v13 = vadd.f32 %v1890_v9, %v2711_v34  ;;  %v1893_v14 = vadd.f32 %v1892_v12, %v1891_v10  ;;  %v1954_v17 = vadd.f32 %v1953_v16, %v1952_v11  ;;  %v1955_v19 = vpop.f32.mrb[26].mxu1 }
 0x136   : > { %v1956_v21 = vpop.f32.mrb[27].mxu1 }
 0x137   : > { %v908_v20 = vadd.f32 %v1893_v14, %v2711_v34  ;;  %v2751_v22 = vadd.f32 %v1954_v17, %v905_v13  ;;  %v1957_v23 = vadd.f32 %v1956_v21, %v1955_v19 }
 0x139   : > { %v1894_v24 = vpop.f32.mrb[28].mxu0  ;;  %v2753_v25 = vadd.f32 %v1957_v23, %v908_v20 }
 0x13a   : > { %v1895_v26 = vpop.f32.mrb[29].mxu0 }
 0x13b   : > { %v1896_v27 = vadd.f32 %v1895_v26, %v1894_v24  ;;  %v1897_v28 = vpop.f32.mrb[30].mxu0  ;;  %v1958_v29 = vpop.f32.mrb[28].mxu1 }
 0x13c   : > { %v1898_v30 = vpop.f32.mrb[31].mxu0  ;;  %v1959_v36 = vpop.f32.mrb[29].mxu1 }
 0x13d   : > { %v913_v32 = vadd.f32 %v1896_v27, %v2711_v34  ;;  %v1899_v33 = vadd.f32 %v1898_v30, %v1897_v28  ;;  %v1960_v37 = vadd.f32 %v1959_v36, %v1958_v29  ;;  %v1961_v38 = vpop.f32.mrb[30].mxu1 }
 0x13e   : > { %v1962_v40 = vpop.f32.mrb[31].mxu1 }
 0x13f   : > { %v916_v39 = vadd.f32 %v1899_v33, %v2711_v34  ;;  %v2757_v41 = vadd.f32 %v1960_v37, %v913_v32  ;;  %v1963_v42 = vadd.f32 %v1962_v40, %v1961_v38 }
 0x141   : > { %v1980_v43 = vpop.f32.mrb[32].mxu0  ;;  %v2759_v44 = vadd.f32 %v1963_v42, %v916_v39 }
 0x142   : > { %v1981_v45 = vpop.f32.mrb[33].mxu0 }
 0x143   : > { %v1982_v46 = vadd.f32 %v1981_v45, %v1980_v43  ;;  %v1983_v48 = vpop.f32.mrb[34].mxu0  ;;  %v2057_v52 = vpop.f32.mrb[32].mxu1 }
 0x144   : > { %v1984_v51 = vpop.f32.mrb[35].mxu0  ;;  %v1147_v56 = vpop.f32.mrb[33].mxu1 }
 0x145   : > { %v1985_v54 = vadd.f32 %v1984_v51, %v1983_v48  ;;  %v1051_v55 = vadd.f32 %v1982_v46, %v2715_v47  ;;  %v2058_v57 = vpop.f32.mrb[34].mxu1 }
 0x146   : > { %v1150_v59 = vpop.f32.mrb[35].mxu1 }
 0x147   : > { %v1148_v58 = vadd.f32 %v1147_v56, %v1051_v55  ;;  %v1054_v34 = vadd.f32 %v1985_v54, %v2717_v50 }
 0x149   : > { %v1226_v60 = vmul.f32 0.01, %v1148_v58  ;;  %v1151_v61 = vadd.f32 %v1150_v59, %v1054_v34  ;;  %v1986_v62 = vpop.f32.mrb[36].mxu0  ;;  %vm1210_vm1 = vcmp.ge.f32.partialorder %v1148_v58, 0.0 }
 0x14a   : > { %v1987_v0 = vpop.f32.mrb[37].mxu0 }
 0x14b   : > { %vm1211_vm2 = vcmp.ge.f32.partialorder %v1151_v61, 0.0  ;;  %v1227_v1 = vmul.f32 0.01, %v1151_v61  ;;  %v1988_v3 = vadd.f32 %v1987_v0, %v1986_v62  ;;  %v1989_v5 = vpop.f32.mrb[38].mxu0  ;;  %v2061_v8 = vpop.f32.mrb[36].mxu1  ;;  %v1242_v10 = vsel %vm1210_vm1, %v1148_v58, %v1226_v60 }
 0x14c   : > { %v1990_v6 = vpop.f32.mrb[39].mxu0  ;;  %v1163_v12 = vpop.f32.mrb[37].mxu1 }
 0x14d   : > { %v1059_v9 = vadd.f32 %v1988_v3, %v2721_v63  ;;  %v1991_v47 = vadd.f32 %v1990_v6, %v1989_v5  ;;  %v1243_v11 = vsel %vm1211_vm2, %v1151_v61, %v1227_v1  ;;  %v2062_v50 = vpop.f32.mrb[38].mxu1 }
 0x14e   : > { %v1258_v13 = vpack.c.bf16 %v1243_v11, %v1242_v10  ;;  %v1166_v17 = vpop.f32.mrb[39].mxu1 }
 0x14f   : > { %v1156_v14 = vadd.f32 %v2057_v52, %v1059_v9  ;;  %v1062_v16 = vadd.f32 %v1991_v47, %v2723_v2 }
 0x150   : > { %2087 = vmatprep.mubr.bf16.mxu1 %v1258_v13 }
 0x151   : > { %v1228_v19 = vmul.f32 0.01, %v1156_v14  ;;  %v1159_v20 = vadd.f32 %v2058_v57, %v1062_v16  ;;  %v1992_v21 = vpop.f32.mrb[40].mxu0  ;;  %vm1212_vm3 = vcmp.ge.f32.partialorder %v1156_v14, 0.0 }
 0x152   : > { %v1993_v23 = vpop.f32.mrb[41].mxu0 }
 0x153   : > { %vm1213_vm4 = vcmp.ge.f32.partialorder %v1159_v20, 0.0  ;;  %v1229_v24 = vmul.f32 0.01, %v1159_v20  ;;  %v1994_v26 = vadd.f32 %v1993_v23, %v1992_v21  ;;  %v1995_v63 = vpop.f32.mrb[42].mxu0  ;;  %v2765_v28 = vpop.f32.mrb[40].mxu1  ;;  %v1244_v29 = vsel %vm1212_vm3, %v1156_v14, %v1228_v19 }
 0x154   : > { %v1996_v27 = vpop.f32.mrb[43].mxu0  ;;  %v1179_v2 = vpop.f32.mrb[41].mxu1 }
 0x155   : > { %v1245_v30 = vsel %vm1213_vm4, %v1159_v20, %v1229_v24  ;;  %v1997_v32 = vadd.f32 %v1996_v27, %v1995_v63  ;;  %v1067_v33 = vadd.f32 %v1994_v26, %v2727_v15  ;;  %v2768_v37 = vpop.f32.mrb[42].mxu1 }
 0x156   : > { %v1259_v36 = vpack.c.bf16 %v1245_v30, %v1244_v29  ;;  %v1182_v40 = vpop.f32.mrb[43].mxu1 }
 0x157   : > { %v1164_v38 = vadd.f32 %v1163_v12, %v1067_v33  ;;  %v1070_v39 = vadd.f32 %v1997_v32, %v2729_v18 }
 0x158   : > { %2088 = vmatmul.mubr.bf16.vlgmr.msra.gmra.mrb[48].mxu1 %v1259_v36 }
 0x159   : > { %v1230_v42 = vmul.f32 0.01, %v1164_v38  ;;  %v1167_v43 = vadd.f32 %v1166_v17, %v1070_v39  ;;  %v1998_v45 = vpop.f32.mrb[44].mxu0  ;;  %vm1214_vm5 = vcmp.ge.f32.partialorder %v1164_v38, 0.0 }
 0x15a   : > { %v1999_v46 = vpop.f32.mrb[45].mxu0 }
 0x15b   : > { %vm1215_vm6 = vcmp.ge.f32.partialorder %v1167_v43, 0.0  ;;  %v1231_v48 = vmul.f32 0.01, %v1167_v43  ;;  %v2000_v51 = vadd.f32 %v1999_v46, %v1998_v45  ;;  %v2001_v52 = vpop.f32.mrb[46].mxu0  ;;  %v2771_v15 = vpop.f32.mrb[44].mxu1  ;;  %v1246_v57 = vsel %vm1214_vm5, %v1164_v38, %v1230_v42 }
 0x15c   : > { %v2002_v54 = vpop.f32.mrb[47].mxu0  ;;  %v1195_v18 = vpop.f32.mrb[45].mxu1 }
 0x15d   : > { %v1075_v55 = vadd.f32 %v2000_v51, %v2733_v31  ;;  %v2003_v56 = vadd.f32 %v2002_v54, %v2001_v52  ;;  %v1247_v58 = vsel %vm1215_vm6, %v1167_v43, %v1231_v48  ;;  %v2774_v59 = vpop.f32.mrb[46].mxu1 }
 0x15e   : > { %v1260_v34 = vpack.c.bf16 %v1247_v58, %v1246_v57  ;;  %v1198_v62 = vpop.f32.mrb[47].mxu1 }
 0x15f   : > { %v1172_v60 = vadd.f32 %v2061_v8, %v1075_v55  ;;  %v1078_v61 = vadd.f32 %v2003_v56, %v2735_v35 }
 0x160   : > { %2091 = vmatprep.mubr.bf16.mxu1 %v1260_v34 }
 0x161   : > { %v1232_v0 = vmul.f32 0.01, %v1172_v60  ;;  %v1175_v1 = vadd.f32 %v2062_v50, %v1078_v61  ;;  %v2004_v3 = vpop.f32.mrb[48].mxu0  ;;  %vm1216_vm7 = vcmp.ge.f32.partialorder %v1172_v60, 0.0 }
 0x162   : > { %v2005_v5 = vpop.f32.mrb[49].mxu0 }
 0x163   : > { %v1233_v6 = vmul.f32 0.01, %v1175_v1  ;;  %v2006_v9 = vadd.f32 %v2005_v5, %v2004_v3  ;;  %v2007_v31 = vpop.f32.mrb[50].mxu0  ;;  %vm1217_vm8 = vcmp.ge.f32.partialorder %v1175_v1, 0.0  ;;  %v1248_v12 = vsel %vm1216_vm7, %v1172_v60, %v1232_v0 }
 0x164   : > { %v2008_v47 = vpop.f32.mrb[51].mxu0 }
 0x165   : > { %v2009_v10 = vadd.f32 %v2008_v47, %v2007_v31  ;;  %v1083_v11 = vadd.f32 %v2006_v9, %v2739_v49  ;;  %v1249_v13 = vsel %vm1217_vm8, %v1175_v1, %v1233_v6 }
 0x166   : > { %v1261_v8 = vpack.c.bf16 %v1249_v13, %v1248_v12 }
 0x167   : > { %v1180_v14 = vadd.f32 %v1179_v2, %v1083_v11  ;;  %v1086_v35 = vadd.f32 %v2009_v10, %v2741_v53 }
 0x168   : > { %2092 = vmatmul.mubr.bf16.gmra.mrb[52].mxu1 %v1261_v8 }
 0x169   : > { %v1234_v16 = vmul.f32 0.01, %v1180_v14  ;;  %v1183_v50 = vadd.f32 %v1182_v40, %v1086_v35  ;;  %v2010_v17 = vpop.f32.mrb[52].mxu0  ;;  %vm1218_vm9 = vcmp.ge.f32.partialorder %v1180_v14, 0.0 }
 0x16a   : > { %v2011_v19 = vpop.f32.mrb[53].mxu0 }
 0x16b   : > { %vm1219_vm10 = vcmp.ge.f32.partialorder %v1183_v50, 0.0  ;;  %v1235_v20 = vmul.f32 0.01, %v1183_v50  ;;  %v2012_v21 = vadd.f32 %v2011_v19, %v2010_v17  ;;  %v2013_v23 = vpop.f32.mrb[54].mxu0  ;;  %v1250_v63 = vsel %vm1218_vm9, %v1180_v14, %v1234_v16 }
 0x16c   : > { %v2014_v24 = vpop.f32.mrb[55].mxu0 }
 0x16d   : > { %v1091_v26 = vadd.f32 %v2012_v21, %v2745_v4  ;;  %v2015_v49 = vadd.f32 %v2014_v24, %v2013_v23  ;;  %v1251_v27 = vsel %vm1219_vm10, %v1183_v50, %v1235_v20 }
 0x16e   : > { %v1262_v29 = vpack.c.bf16 %v1251_v27, %v1250_v63 }
 0x16f   : > { %v1188_v30 = vadd.f32 %v2765_v28, %v1091_v26  ;;  %v1094_v53 = vadd.f32 %v2015_v49, %v2747_v7 }
 0x170   : > { %2095 = vmatprep.mubr.bf16.mxu1 %v1262_v29 }
 0x171   : > { %v1236_v32 = vmul.f32 0.01, %v1188_v30  ;;  %v1191_v33 = vadd.f32 %v2768_v37, %v1094_v53  ;;  %v2016_v2 = vpop.f32.mrb[56].mxu0  ;;  %vm1220_vm11 = vcmp.ge.f32.partialorder %v1188_v30, 0.0 }
 0x172   : > { %v2017_v36 = vpop.f32.mrb[57].mxu0 }
 0x173   : > { %v1237_v38 = vmul.f32 0.01, %v1191_v33  ;;  %v2018_v39 = vadd.f32 %v2017_v36, %v2016_v2  ;;  %v2019_v40 = vpop.f32.mrb[58].mxu0  ;;  %vm1221_vm12 = vcmp.ge.f32.partialorder %v1191_v33, 0.0  ;;  %v1252_v45 = vsel %vm1220_vm11, %v1188_v30, %v1236_v32 }
 0x174   : > { %v2020_v4 = vpop.f32.mrb[59].mxu0 }
 0x175   : > { %v2021_v42 = vadd.f32 %v2020_v4, %v2019_v40  ;;  %v1099_v43 = vadd.f32 %v2018_v39, %v2751_v22  ;;  %v1253_v46 = vsel %vm1221_vm12, %v1191_v33, %v1237_v38 }
 0x176   : > { %v1263_v28 = vpack.c.bf16 %v1253_v46, %v1252_v45 }
 0x177   : > { %v1196_v48 = vadd.f32 %v1195_v18, %v1099_v43  ;;  %v1102_v7 = vadd.f32 %v2021_v42, %v2753_v25 }
 0x178   : > { %2096 = vmatmul.mubr.bf16.gmra.mrb[56].mxu1 %v1263_v28 }
 0x179   : > { %v1238_v51 = vmul.f32 0.01, %v1196_v48  ;;  %v1199_v37 = vadd.f32 %v1198_v62, %v1102_v7  ;;  %v2022_v52 = vpop.f32.mrb[60].mxu0  ;;  %vm1222_vm13 = vcmp.ge.f32.partialorder %v1196_v48, 0.0 }
 0x17a   : > { %v2023_v54 = vpop.f32.mrb[61].mxu0 }
 0x17b   : > { %vm1223_vm14 = vcmp.ge.f32.partialorder %v1199_v37, 0.0  ;;  %v1239_v55 = vmul.f32 0.01, %v1199_v37  ;;  %v2024_v56 = vadd.f32 %v2023_v54, %v2022_v52  ;;  %v2025_v57 = vpop.f32.mrb[62].mxu0  ;;  %v1254_v60 = vsel %vm1222_vm13, %v1196_v48, %v1238_v51 }
 0x17c   : > { %v2026_v58 = vpop.f32.mrb[63].mxu0 }
 0x17d   : > { %v1107_v34 = vadd.f32 %v2024_v56, %v2757_v41  ;;  %v2027_v22 = vadd.f32 %v2026_v58, %v2025_v57  ;;  %v1255_v61 = vsel %vm1223_vm14, %v1199_v37, %v1239_v55  ;;  %v1482_v41 = vlaneseq }
 0x17e   : > { %v1264_v0 = vpack.c.bf16 %v1255_v61, %v1254_v60 }
 0x17f   : > { %v1204_v18 = vadd.f32 %v2771_v15, %v1107_v34  ;;  %v1110_v25 = vadd.f32 %v2027_v22, %v2759_v44  ;;  %v2789_v31 = vand.u32 127, %v1482_v41  ;;  %v2794_v15 = vld [vmem:[%s3152_s4] ss:$0 sm:$0xff] }
 0x180   : > { %2099 = vmatprep.mubr.bf16.mxu1 %v1264_v0 }
 0x181   : > { %v1240_v62 = vmul.f32 0.01, %v1204_v18  ;;  %v1207_v1 = vadd.f32 %v2774_v59, %v1110_v25  ;;  %vm1224_vm15 = vcmp.ge.f32.partialorder %v1204_v18, 0.0  ;;  %vm1484_vm1 = vcmp.ge.s32.totalorder %v2789_v31, 64 }
 0x182   : > { %vm1485_vm2 = vcmp.lt.s32.totalorder %v2789_v31, 74 }
 0x183   : > { %v1241_v3 = vmul.f32 0.01, %v1207_v1  ;;  %vm1225_vm0 = vcmp.ge.f32.partialorder %v1207_v1, 0.0  ;;  %v1256_v5 = vsel %vm1224_vm15, %v1204_v18, %v1240_v62  ;;  %vm2801_vm4 = vmand %vm1484_vm1, %vm1485_vm2 }
 0x185   : > { %v1257_v6 = vsel %vm1225_vm0, %v1207_v1, %v1241_v3 }
 0x186   : > { %v1265_v9 = vpack.c.bf16 %v1257_v6, %v1256_v5 }
 0x188   : > { %2100 = vmatmul.mubr.bf16.gmra.mrb[60].mxu1 %v1265_v9 }
 0x22b   : > { %v2089_v44 = vpop.f32.mrb[48].mxu1 }
 0x22c   : > { %v1380_v59 = vadd.f32 %v2089_v44, %v2794_v15  ;;  %v1371_v47 = vpop.f32.mrb[49].mxu1 }
 0x22d   : > { %v1372_v10 = vadd.f32 %v2794_v15, %v1371_v47  ;;  %v2090_v11 = vpop.f32.mrb[50].mxu1 }
 0x22e   : > { %v1452_v12 = vmul.f32 0.01, %v1380_v59  ;;  %v1383_v13 = vadd.f32 %v2090_v11, %v2794_v15  ;;  %v1374_v8 = vpop.f32.mrb[51].mxu1  ;;  %vm1436_vm3 = vcmp.ge.f32.partialorder %v1380_v59, 0.0 }
 0x22f   : > { %v1450_v35 = vmul.f32 0.01, %v1372_v10  ;;  %v1375_v16 = vadd.f32 %v2794_v15, %v1374_v8  ;;  %vm1434_vm5 = vcmp.ge.f32.partialorder %v1372_v10, 0.0 }
 0x230   : > { %v1453_v50 = vmul.f32 0.01, %v1383_v13  ;;  %v2806_v17 = vsel %vm1436_vm3, %v1380_v59, %v1452_v12  ;;  %vm1437_vm6 = vcmp.ge.f32.partialorder %v1383_v13, 0.0 }
 0x231   : > { %v1451_v19 = vmul.f32 0.01, %v1375_v16  ;;  %v2811_v20 = vsel %vm2801_vm4, %v2806_v17, -1e+30  ;;  %v2813_v21 = vsel %vm1434_vm5, %v1372_v10, %v1450_v35  ;;  %vm1435_vm7 = vcmp.ge.f32.partialorder %v1375_v16, 0.0 }
 0x232   : > { %1507 = vmax.xlane.f32.xlu1 %v2811_v20  ;;  %v2819_v23 = vsel %vm2801_vm4, %v2813_v21, -1e+30  ;;  %v2821_v24 = vsel %vm1437_vm6, %v1383_v13, %v1453_v50 }
 0x233   : > { %1503 = vmax.xlane.f32.xlu0 %v2819_v23  ;;  %v2824_v26 = vsel %vm1435_vm7, %v1375_v16, %v1451_v19  ;;  %v2829_v49 = vsel %vm2801_vm4, %v2821_v24, -1e+30 }
 0x234   : > { %v2835_v63 = vsel %vm2801_vm4, %v2824_v26, -1e+30 }
 0x236   : > { %1509 = vmax.xlane.f32.xlu1 %v2829_v49 }
 0x237   : > { %1505 = vmax.xlane.f32.xlu0 %v2835_v63 }
 0x23b   : > { %v2093_v27 = vpop.f32.mrb[52].mxu1 }
 0x23c   : > { %v1396_v29 = vadd.f32 %v2093_v27, %v2794_v15  ;;  %v1387_v30 = vpop.f32.mrb[53].mxu1 }
 0x23d   : > { %v1388_v53 = vadd.f32 %v2794_v15, %v1387_v30  ;;  %v2094_v32 = vpop.f32.mrb[54].mxu1 }
 0x23e   : > { %v1456_v33 = vmul.f32 0.01, %v1396_v29  ;;  %v1399_v2 = vadd.f32 %v2094_v32, %v2794_v15  ;;  %v1390_v36 = vpop.f32.mrb[55].mxu1  ;;  %vm1440_vm8 = vcmp.ge.f32.partialorder %v1396_v29, 0.0 }
 0x23f   : > { %v1454_v38 = vmul.f32 0.01, %v1388_v53  ;;  %v1391_v39 = vadd.f32 %v2794_v15, %v1390_v36  ;;  %vm1438_vm9 = vcmp.ge.f32.partialorder %v1388_v53, 0.0 }
 0x240   : > { %v1457_v40 = vmul.f32 0.01, %v1399_v2  ;;  %v2842_v4 = vsel %vm1440_vm8, %v1396_v29, %v1456_v33  ;;  %vm1441_vm10 = vcmp.ge.f32.partialorder %v1399_v2, 0.0 }
 0x241   : > { %v1455_v42 = vmul.f32 0.01, %v1391_v39  ;;  %v2847_v43 = vsel %vm2801_vm4, %v2842_v4, -1e+30  ;;  %vm1439_vm11 = vcmp.ge.f32.partialorder %v1391_v39, 0.0  ;;  %v2852_v46 = vsel %vm1438_vm9, %v1388_v53, %v1454_v38 }
 0x242   : > { %1515 = vmax.xlane.f32.xlu0 %v2847_v43  ;;  %v2850_v45 = vsel %vm1441_vm10, %v1399_v2, %v1457_v40  ;;  %v2865_v7 = vsel %vm2801_vm4, %v2852_v46, -1e+30 }
 0x243   : > { %v2857_v28 = vsel %vm2801_vm4, %v2850_v45, -1e+30  ;;  %v2860_v48 = vsel %vm1439_vm11, %v1391_v39, %v1455_v42 }
 0x244   : > { %1517 = vmax.xlane.f32.xlu1 %v2857_v28  ;;  %v2871_v51 = vsel %vm2801_vm4, %v2860_v48, -1e+30 }
 0x246   : > { %1511 = vmax.xlane.f32.xlu0 %v2865_v7 }
 0x248   : > { %1513 = vmax.xlane.f32.xlu1 %v2871_v51 }
 0x24b   : > { %v2097_v37 = vpop.f32.mrb[56].mxu1 }
 0x24c   : > { %v1412_v52 = vadd.f32 %v2097_v37, %v2794_v15  ;;  %v1403_v54 = vpop.f32.mrb[57].mxu1 }
 0x24d   : > { %v1404_v55 = vadd.f32 %v2794_v15, %v1403_v54  ;;  %v2098_v56 = vpop.f32.mrb[58].mxu1 }
 0x24e   : > { %v1460_v57 = vmul.f32 0.01, %v1412_v52  ;;  %v1415_v58 = vadd.f32 %v2098_v56, %v2794_v15  ;;  %v1406_v34 = vpop.f32.mrb[59].mxu1  ;;  %vm1444_vm12 = vcmp.ge.f32.partialorder %v1412_v52, 0.0 }
 0x24f   : > { %v1458_v22 = vmul.f32 0.01, %v1404_v55  ;;  %v1407_v60 = vadd.f32 %v2794_v15, %v1406_v34  ;;  %vm1442_vm13 = vcmp.ge.f32.partialorder %v1404_v55, 0.0 }
 0x250   : > { %v1461_v61 = vmul.f32 0.01, %v1415_v58  ;;  %v2878_v0 = vsel %vm1444_vm12, %v1412_v52, %v1460_v57  ;;  %vm1445_vm14 = vcmp.ge.f32.partialorder %v1415_v58, 0.0 }
 0x251   : > { %v1459_v18 = vmul.f32 0.01, %v1407_v60  ;;  %v2883_v25 = vsel %vm2801_vm4, %v2878_v0, -1e+30  ;;  %vm1443_vm15 = vcmp.ge.f32.partialorder %v1407_v60, 0.0  ;;  %v2888_v1 = vsel %vm1442_vm13, %v1404_v55, %v1458_v22 }
 0x252   : > { %1523 = vmax.xlane.f32.xlu0 %v2883_v25  ;;  %v2886_v62 = vsel %vm1445_vm14, %v1415_v58, %v1461_v61  ;;  %v2901_v6 = vsel %vm2801_vm4, %v2888_v1, -1e+30 }
 0x253   : > { %v2893_v3 = vsel %vm2801_vm4, %v2886_v62, -1e+30  ;;  %v2896_v5 = vsel %vm1443_vm15, %v1407_v60, %v1459_v18 }
 0x254   : > { %1525 = vmax.xlane.f32.xlu1 %v2893_v3  ;;  %v2907_v9 = vsel %vm2801_vm4, %v2896_v5, -1e+30 }
 0x256   : > { %1519 = vmax.xlane.f32.xlu0 %v2901_v6 }
 0x258   : > { %1521 = vmax.xlane.f32.xlu1 %v2907_v9 }
 0x25b   : > { %v2101_v41 = vpop.f32.mrb[60].mxu1 }
 0x25c   : > { %v1428_v44 = vadd.f32 %v2101_v41, %v2794_v15  ;;  %v1419_v59 = vpop.f32.mrb[61].mxu1 }
 0x25d   : > { %v1420_v47 = vadd.f32 %v2794_v15, %v1419_v59  ;;  %v2102_v10 = vpop.f32.mrb[62].mxu1 }
 0x25e   : > { %v1431_v11 = vadd.f32 %v2102_v10, %v2794_v15  ;;  %v1422_v12 = vpop.f32.mrb[63].mxu1  ;;  %v1464_v13 = vmul.f32 0.01, %v1428_v44  ;;  %vm1448_vm1 = vcmp.ge.f32.partialorder %v1428_v44, 0.0 }
 0x25f   : > { %v1462_v8 = vmul.f32 0.01, %v1420_v47  ;;  %v1423_v35 = vadd.f32 %v2794_v15, %v1422_v12  ;;  %vm1446_vm0 = vcmp.ge.f32.partialorder %v1420_v47, 0.0 }
 0x260   : > { %v1465_v16 = vmul.f32 0.01, %v1431_v11  ;;  %vm1449_vm3 = vcmp.ge.f32.partialorder %v1431_v11, 0.0  ;;  %v2924_v30 = vsel %vm1448_vm1, %v1428_v44, %v1464_v13 }
 0x261   : > { %v1463_v50 = vmul.f32 0.01, %v1423_v35  ;;  %v2914_v19 = vsel %vm1446_vm0, %v1420_v47, %v1462_v8  ;;  %vm1447_vm2 = vcmp.ge.f32.partialorder %v1423_v35, 0.0  ;;  %v2937_v32 = vsel %vm2801_vm4, %v2924_v30, -1e+30 }
 0x262   : > { %v2919_v27 = vsel %vm2801_vm4, %v2914_v19, -1e+30  ;;  %v2932_v53 = vsel %vm1449_vm3, %v1431_v11, %v1465_v16 }
 0x263   : > { %1527 = vmax.xlane.f32.xlu0 %v2919_v27  ;;  %v2922_v29 = vsel %vm1447_vm2, %v1423_v35, %v1463_v50  ;;  %v2943_v33 = vsel %vm2801_vm4, %v2932_v53, -1e+30 }
 0x264   : > { %v2929_v15 = vsel %vm2801_vm4, %v2922_v29, -1e+30  ;;  %vm1647_vm4 = vcmp.lt.s32.totalorder %v2789_v31, 64 }
 0x265   : > { %1529 = vmax.xlane.f32.xlu1 %v2929_v15 }
 0x267   : > { %1531 = vmax.xlane.f32.xlu0 %v2937_v32 }
 0x269   : > { %1533 = vmax.xlane.f32.xlu1 %v2943_v33 }
 0x2bf   : > { %v1508_v2 = vpop.xlane.xlu1 %1507 }
 0x2c0   : > { %v1537_v36 = vsub.f32 %v2811_v20, %v1508_v2  ;;  %v1504_v38 = vpop.xlane.xlu0 %1503 }
 0x2c1   : > { %v1535_v39 = vsub.f32 %v2819_v23, %v1504_v38 }
 0x2c2   : > { %v1555_v40 = vmul.f32 1.442695, %v1537_v36 }
 0x2c3   : > { %v1551_v42 = vmul.f32 1.442695, %v1535_v39  ;;  %v1510_v37 = vpop.xlane.xlu1 %1509 }
 0x2c4   : > { %2202 = vpow2.f32 %v1555_v40  ;;  %v1538_v52 = vsub.f32 %v2829_v49, %v1510_v37  ;;  %v1506_v54 = vpop.xlane.xlu0 %1505 }
 0x2c5   : > { %v1536_v55 = vsub.f32 %v2835_v63, %v1506_v54  ;;  %2204 = vpow2.f32 %v1551_v42 }
 0x2c6   : > { %v1557_v14 = vmul.f32 1.442695, %v1538_v52 }
 0x2c7   : > { %v1553_v56 = vmul.f32 1.442695, %v1536_v55 }
 0x2c8   : > { %2206 = vpow2.f32 %v1557_v14 }
 0x2c9   : > { %2208 = vpow2.f32 %v1553_v56 }
 0x2ce   : > { %v2950_v57 = vpop.eup %2202 }
 0x2cf   : > { %1587 = vadd.xlane.f32.xlu0 %v2950_v57  ;;  %v1516_v20 = vpop.xlane.xlu0 %1515  ;;  %v2954_v58 = vpop.eup %2204 }
 0x2d0   : > { %v1541_v23 = vsub.f32 %v2847_v43, %v1516_v20 }
 0x2d1   : > { %v1518_v34 = vpop.xlane.xlu1 %1517 }
 0x2d2   : > { %v2956_v22 = vpop.eup %2206  ;;  %v1563_v49 = vmul.f32 1.442695, %v1541_v23  ;;  %v1542_v63 = vsub.f32 %v2857_v28, %v1518_v34 }
 0x2d3   : > { %1589 = vadd.xlane.f32.xlu1 %v2956_v22  ;;  %1583 = vadd.xlane.f32.xlu0 %v2954_v58  ;;  %v1512_v60 = vpop.xlane.xlu0 %1511  ;;  %v2962_v44 = vpop.eup %2208 }
 0x2d4   : > { %2210 = vpow2.f32 %v1563_v49  ;;  %v1565_v61 = vmul.f32 1.442695, %v1542_v63  ;;  %v1539_v18 = vsub.f32 %v2865_v7, %v1512_v60 }
 0x2d5   : > { %v1514_v41 = vpop.xlane.xlu1 %1513 }
 0x2d6   : > { %2212 = vpow2.f32 %v1565_v61  ;;  %v1559_v43 = vmul.f32 1.442695, %v1539_v18  ;;  %v1540_v59 = vsub.f32 %v2871_v51, %v1514_v41 }
 0x2d7   : > { %1585 = vadd.xlane.f32.xlu1 %v2962_v44 }
 0x2d8   : > { %2214 = vpow2.f32 %v1559_v43  ;;  %v1561_v28 = vmul.f32 1.442695, %v1540_v59 }
 0x2da   : > { %2216 = vpow2.f32 %v1561_v28 }
 0x2de   : > { %v2966_v47 = vpop.eup %2210 }
 0x2df   : > { %1595 = vadd.xlane.f32.xlu0 %v2966_v47  ;;  %v1524_v10 = vpop.xlane.xlu0 %1523 }
 0x2e0   : > { %v2969_v11 = vpop.eup %2212  ;;  %v1545_v7 = vsub.f32 %v2883_v25, %v1524_v10 }
 0x2e1   : > { %v1526_v12 = vpop.xlane.xlu1 %1525  ;;  %1597 = vadd.xlane.f32.xlu1 %v2969_v11 }
 0x2e2   : > { %v2973_v13 = vpop.eup %2214  ;;  %v1571_v51 = vmul.f32 1.442695, %v1545_v7  ;;  %v1546_v8 = vsub.f32 %v2893_v3, %v1526_v12 }
 0x2e3   : > { %1591 = vadd.xlane.f32.xlu0 %v2973_v13  ;;  %v1520_v35 = vpop.xlane.xlu0 %1519 }
 0x2e4   : > { %v2977_v16 = vpop.eup %2216  ;;  %2218 = vpow2.f32 %v1571_v51  ;;  %v1573_v50 = vmul.f32 1.442695, %v1546_v8  ;;  %v1543_v2 = vsub.f32 %v2901_v6, %v1520_v35 }
 0x2e5   : > { %v1522_v36 = vpop.xlane.xlu1 %1521  ;;  %1593 = vadd.xlane.f32.xlu1 %v2977_v16 }
 0x2e6   : > { %2220 = vpow2.f32 %v1573_v50  ;;  %v1567_v25 = vmul.f32 1.442695, %v1543_v2  ;;  %v1544_v38 = vsub.f32 %v2907_v9, %v1522_v36 }
 0x2e8   : > { %2222 = vpow2.f32 %v1567_v25  ;;  %v1569_v39 = vmul.f32 1.442695, %v1544_v38 }
 0x2ea   : > { %2224 = vpow2.f32 %v1569_v39 }
 0x2ee   : > { %v2982_v3 = vpop.eup %2218 }
 0x2ef   : > { %1603 = vadd.xlane.f32.xlu0 %v2982_v3 }
 0x2f0   : > { %v2985_v40 = vpop.eup %2220  ;;  %v1528_v42 = vpop.xlane.xlu0 %1527 }
 0x2f1   : > { %v1547_v37 = vsub.f32 %v2919_v27, %v1528_v42  ;;  %1605 = vadd.xlane.f32.xlu1 %v2985_v40 }
 0x2f2   : > { %v2989_v6 = vpop.eup %2222  ;;  %v1530_v52 = vpop.xlane.xlu1 %1529 }
 0x2f3   : > { %v1575_v54 = vmul.f32 1.442695, %v1547_v37  ;;  %v1548_v9 = vsub.f32 %v2929_v15, %v1530_v52  ;;  %1599 = vadd.xlane.f32.xlu0 %v2989_v6 }
 0x2f4   : > { %v2993_v55 = vpop.eup %2224  ;;  %v1532_v14 = vpop.xlane.xlu0 %1531 }
 0x2f5   : > { %2226 = vpow2.f32 %v1575_v54  ;;  %v1577_v56 = vmul.f32 1.442695, %v1548_v9  ;;  %v1549_v20 = vsub.f32 %v2937_v32, %v1532_v14  ;;  %1601 = vadd.xlane.f32.xlu1 %v2993_v55 }
 0x2f6   : > { %v1534_v27 = vpop.xlane.xlu1 %1533 }
 0x2f7   : > { %2228 = vpow2.f32 %v1577_v56  ;;  %v1579_v23 = vmul.f32 1.442695, %v1549_v20  ;;  %v1550_v34 = vsub.f32 %v2943_v33, %v1534_v27 }
 0x2f9   : > { %2230 = vpow2.f32 %v1579_v23  ;;  %v1581_v49 = vmul.f32 1.442695, %v1550_v34 }
 0x2fb   : > { %2232 = vpow2.f32 %v1581_v49 }
 0x2ff   : > { %v2998_v15 = vpop.eup %2226 }
 0x300   : > { %1607 = vadd.xlane.f32.xlu0 %v2998_v15 }
 0x301   : > { %v3001_v63 = vpop.eup %2228 }
 0x302   : > { %1609 = vadd.xlane.f32.xlu1 %v3001_v63 }
 0x303   : > { %v3004_v32 = vpop.eup %2230 }
 0x304   : > { %1611 = vadd.xlane.f32.xlu0 %v3004_v32 }
 0x305   : > { %v3007_v60 = vpop.eup %2232 }
 0x306   : > { %1613 = vadd.xlane.f32.xlu1 %v3007_v60 }
 0x35c   : > { %v1588_v33 = vpop.xlane.xlu0 %1587 }
 0x35d   : > { %2234 = vrcp.f32 %v1588_v33 }
 0x360   : > { %v1590_v61 = vpop.xlane.xlu1 %1589  ;;  %v1584_v18 = vpop.xlane.xlu0 %1583 }
 0x361   : > { %2236 = vrcp.f32 %v1590_v61 }
 0x362   : > { %2238 = vrcp.f32 %v1584_v18 }
 0x364   : > { %v1586_v41 = vpop.xlane.xlu1 %1585 }
 0x365   : > { %2240 = vrcp.f32 %v1586_v41 }
 0x367   : > { %v2235_v43 = vpop.eup %2234 }
 0x368   : > { %v1620_v59 = vmul.f32 %v2235_v43, %v2950_v57 }
 0x36a   : > { %v1650_v28 = vsel %vm1647_vm4, %v2806_v17, %v1620_v59 }
 0x36b   : > { %v2237_v10 = vpop.eup %2236  ;;  %1666 = vst [vmem:[%s3018_s26 + $0x10] sm:$0xff] %v1650_v28 }
 0x36c   : > { %v2239_v7 = vpop.eup %2238  ;;  %v1622_v12 = vmul.f32 %v2237_v10, %v2956_v22  ;;  %v1596_v51 = vpop.xlane.xlu0 %1595 }
 0x36d   : > { %v1616_v8 = vmul.f32 %v2239_v7, %v2954_v58  ;;  %2242 = vrcp.f32 %v1596_v51 }
 0x36e   : > { %v1651_v57 = vsel %vm1647_vm4, %v2821_v24, %v1622_v12  ;;  %v1598_v17 = vpop.xlane.xlu1 %1597 }
 0x36f   : > { %v2241_v35 = vpop.eup %2240  ;;  %1667 = vst [vmem:[%s3018_s26 + $0x18] sm:$0xff] %v1651_v57  ;;  %v1648_v50 = vsel %vm1647_vm4, %v2813_v21, %v1616_v8  ;;  %2244 = vrcp.f32 %v1598_v17 }
 0x370   : > { %1664 = vst [vmem:[%s3018_s26] sm:$0xff] %v1648_v50  ;;  %v1618_v22 = vmul.f32 %v2241_v35, %v2962_v44  ;;  %v1592_v2 = vpop.xlane.xlu0 %1591 }
 0x371   : > { %2246 = vrcp.f32 %v1592_v2 }
 0x372   : > { %v1649_v58 = vsel %vm1647_vm4, %v2824_v26, %v1618_v22  ;;  %v1594_v24 = vpop.xlane.xlu1 %1593 }
 0x373   : > { %1665 = vst [vmem:[%s3018_s26 + $0x8] sm:$0xff] %v1649_v58  ;;  %2248 = vrcp.f32 %v1594_v24 }
 0x377   : > { %v2243_v36 = vpop.eup %2242 }
 0x378   : > { %v1628_v25 = vmul.f32 %v2243_v36, %v2966_v47 }
 0x379   : > { %v2245_v21 = vpop.eup %2244 }
 0x37a   : > { %v1654_v38 = vsel %vm1647_vm4, %v2842_v4, %v1628_v25  ;;  %v1630_v44 = vmul.f32 %v2245_v21, %v2969_v11 }
 0x37b   : > { %v2247_v39 = vpop.eup %2246  ;;  %1670 = vst [vmem:[%s3018_s26 + $0x30] sm:$0xff] %v1654_v38 }
 0x37c   : > { %v1655_v26 = vsel %vm1647_vm4, %v2850_v45, %v1630_v44  ;;  %v1624_v42 = vmul.f32 %v2247_v39, %v2973_v13  ;;  %v1604_v37 = vpop.xlane.xlu0 %1603 }
 0x37d   : > { %v2249_v52 = vpop.eup %2248  ;;  %1671 = vst [vmem:[%s3018_s26 + $0x38] sm:$0xff] %v1655_v26  ;;  %2250 = vrcp.f32 %v1604_v37 }
 0x37e   : > { %v1652_v47 = vsel %vm1647_vm4, %v2852_v46, %v1624_v42  ;;  %v1626_v4 = vmul.f32 %v2249_v52, %v2977_v16  ;;  %v1606_v11 = vpop.xlane.xlu1 %1605 }
 0x37f   : > { %1668 = vst [vmem:[%s3018_s26 + $0x20] sm:$0xff] %v1652_v47  ;;  %2252 = vrcp.f32 %v1606_v11 }
 0x380   : > { %v1653_v45 = vsel %vm1647_vm4, %v2860_v48, %v1626_v4  ;;  %v1600_v13 = vpop.xlane.xlu0 %1599 }
 0x381   : > { %1669 = vst [vmem:[%s3018_s26 + $0x28] sm:$0xff] %v1653_v45  ;;  %2254 = vrcp.f32 %v1600_v13 }
 0x382   : > { %v1602_v54 = vpop.xlane.xlu1 %1601 }
 0x383   : > { %2256 = vrcp.f32 %v1602_v54 }
 0x387   : > { %v2251_v9 = vpop.eup %2250 }
 0x388   : > { %v1636_v46 = vmul.f32 %v2251_v9, %v2982_v3 }
 0x389   : > { %v2253_v14 = vpop.eup %2252 }
 0x38a   : > { %v1658_v16 = vsel %vm1647_vm4, %v2878_v0, %v1636_v46  ;;  %v1638_v56 = vmul.f32 %v2253_v14, %v2985_v40 }
 0x38b   : > { %v2255_v20 = vpop.eup %2254  ;;  %1674 = vst [vmem:[%s3018_s26 + $0x50] sm:$0xff] %v1658_v16 }
 0x38c   : > { %v1659_v48 = vsel %vm1647_vm4, %v2886_v62, %v1638_v56  ;;  %v1632_v27 = vmul.f32 %v2255_v20, %v2989_v6 }
 0x38d   : > { %v2257_v23 = vpop.eup %2256  ;;  %1675 = vst [vmem:[%s3018_s26 + $0x58] sm:$0xff] %v1659_v48  ;;  %v1608_v34 = vpop.xlane.xlu0 %1607 }
 0x38e   : > { %v1656_v3 = vsel %vm1647_vm4, %v2888_v1, %v1632_v27  ;;  %v1634_v0 = vmul.f32 %v2257_v23, %v2993_v55  ;;  %2258 = vrcp.f32 %v1608_v34 }
 0x38f   : > { %1672 = vst [vmem:[%s3018_s26 + $0x40] sm:$0xff] %v1656_v3  ;;  %v1610_v40 = vpop.xlane.xlu1 %1609 }
 0x390   : > { %v1657_v62 = vsel %vm1647_vm4, %v2896_v5, %v1634_v0  ;;  %2260 = vrcp.f32 %v1610_v40 }
 0x391   : > { %1673 = vst [vmem:[%s3018_s26 + $0x48] sm:$0xff] %v1657_v62  ;;  %v1612_v6 = vpop.xlane.xlu0 %1611 }
 0x392   : > { %2262 = vrcp.f32 %v1612_v6 }
 0x393   : > { %v1614_v49 = vpop.xlane.xlu1 %1613 }
 0x394   : > { %2264 = vrcp.f32 %v1614_v49 }
 0x398   : > { %v2259_v1 = vpop.eup %2258 }
 0x399   : > { %v1640_v55 = vmul.f32 %v2259_v1, %v2998_v15 }
 0x39a   : > { %v2261_v33 = vpop.eup %2260 }
 0x39b   : > { %v1660_v61 = vsel %vm1647_vm4, %v2914_v19, %v1640_v55  ;;  %v1642_v18 = vmul.f32 %v2261_v33, %v3001_v63 }
 0x39c   : > { %v2263_v5 = vpop.eup %2262  ;;  %1676 = vst [vmem:[%s3018_s26 + $0x60] sm:$0xff] %v1660_v61 }
 0x39d   : > { %v1661_v41 = vsel %vm1647_vm4, %v2922_v29, %v1642_v18  ;;  %v1644_v15 = vmul.f32 %v2263_v5, %v3004_v32 }
 0x39e   : > { %v2265_v43 = vpop.eup %2264  ;;  %1677 = vst [vmem:[%s3018_s26 + $0x68] sm:$0xff] %v1661_v41 }
 0x39f   : > { %v1662_v19 = vsel %vm1647_vm4, %v2924_v30, %v1644_v15  ;;  %v1646_v63 = vmul.f32 %v2265_v43, %v3007_v60 }
 0x3a0   : > { %1678 = vst [vmem:[%s3018_s26 + $0x70] sm:$0xff] %v1662_v19 }
 0x3a1   : > { %v1663_v29 = vsel %vm1647_vm4, %v2932_v53, %v1646_v63 }
 0x3a2   : > { %1679 = vst [vmem:[%s3018_s26 + $0x78] sm:$0xff] %v1663_v29 }
 0x3a3   : > { %2279 = shalt.err (!%p2276_p3)
}
 0x3a4   : > { %s2280_s15 = scalar_lea.hbm %s3096_s22, 2048  ;;  %s2284_s17 = scalar_lea.hbm %s3153_s5, 4096 }
 0x3a5   : > { %p2281_p4 = scmp.ne.s32.totalorder %s3096_s22, %s2280_s15  ;;  %p2285_p9 = scmp.lt.u32.totalorder %s3096_s22, %s3153_s5 }
 0x3a6   : > { %p2286_p10 = scmp.lt.u32.totalorder %s2284_s17, %s2280_s15  ;;  %p2288_p12 = scmp.lt.u32.totalorder %s2280_s15, %s3096_s22 }
 0x3a7   : > { %p2282_p7 = pnand %p2281_p4, %p2401_p5 }
 0x3a8   : > { %p2287_p11 = por %p2286_p10, %p2285_p9 }
 0x3a9   : > { %p2283_p8 = pneg %p2282_p7 }
 0x3aa   : > { %p2289_p13 = por %p2288_p12, %p2287_p11 }
 0x3ac   : > { %p2290_p0 = pnand %p2289_p13, %p2283_p8 }
 0x3ae   : > { %2293 = shalt.err (!%p2290_p0)
}
 0x3af   : > { %s2331_s26 = smov 128   ;;  %s2332_s6 = smov 8  }
 0x3b0   : > { %2104 = dma.vmem_to_hbm [thread:$0]  (%p2401_p5), %s3098_s7, 2048, %s3096_s22, %s3107_s10, %s2331_s26, %s2331_s26, %s2332_s6  }
 0x3b1 PF: > { %p2110_p1 = scmp.ge.s32.totalorder %s2328_s21, 2  ;;  %s1709_s8 = sand.u32 1, %s2316_s18  }
 0x3b2   : > { %s1710_s9 = scalar_lea.sflag [#allocation3], %s1709_s8 }
 0x3b3   : > { %p2107_p2 = pnand %p2110_p1, %p2405_p6 }
 0x3b5   : > { %2311 = dma.done.wait (!%p2107_p2), %s1710_s9, 2048  }
 0x3b6   : > { %2313 = vsyncadd (!%p2107_p2), %s1710_s9, 4294965248  ;;  %p15_p3 = scmp.ge.s32.totalorder %s2388_s24, 4   ;;  %s3158_s18 = smov %s2320_s19 }
 0x3b7   : > { %s3159_s19 = smov %s2324_s20  ;;  %s3160_s20 = smov %s2399_s27 }
 0x3b8   : > { %s3161_s21 = smov %s2388_s24  ;;  %17 = sbr.rel (!%p15_p3) target bundleno = 3 (0x3), region = 75 }
 0x3bf   :  { %1715 = vsyncpa [#allocation3], 1 }
 0x3c0   :  { %1717 = vsyncpa [#allocation3 + $0x1], 1 }

</bundles_post_ra>
